<compile_context>
chip_gen: v5e
topology: v5e:2x2
jax: 0.10.0
libtpu: 0.0.40
codegen_flags: <defaults>
</compile_context>

<pallas_src>
import functools

import jax
import jax.numpy as jnp
from jax.experimental import pallas as pl
from jax.experimental.pallas import tpu as pltpu


_LANE_W = 512        # kernel last dim: multiple of 128 -> unmasked vst
_ANCHOR_EVERY = 3    # exact sin/cos every 3 octaves (error ~1e-6 << 1e-5 tol)


def _round_up(v, m):
    return ((v + m - 1) // m) * m


def _vmem_capacity_bytes():
    """Per-core VMEM capacity; conservative 64 MiB (v7x) fallback."""
    try:
        return int(pltpu.get_tpu_info().vmem_capacity_bytes)
    except Exception:
        return 64 * 1024 * 1024


def _pos_embed_kernel(x_ref, o_ref, *, n_freqs, anchor_every):
    """x_ref: [TB, LANE_W];  o_ref: [2*F, TB, LANE_W] (lane-dense slabs)."""
    x = x_ref[...].astype(jnp.float32)   # f32 compute (v5e has no bf16 VPU)
    s = c = None
    for k in range(n_freqs):              # static unroll at trace time
        if k % anchor_every == 0:
            ang = float(2.0 ** k) * x     # power-of-two scale: exact in f32
            s = jnp.sin(ang)              # exact anchors match the reference
            c = jnp.cos(ang)
        else:
            # double-angle recurrence: sin(2t)=2 s c, cos(2t)=1-2 s^2
            s, c = 2.0 * s * c, 1.0 - 2.0 * s * s
        o_ref[2 * k] = s.astype(o_ref.dtype)
        o_ref[2 * k + 1] = c.astype(o_ref.dtype)


def _plan_tiles(m, n_freqs, in_itemsize, out_itemsize):
    """Pick row-tile size / padded row count from the VMEM budget."""
    # sublane alignment: 8 rows for 4-byte dtypes, 16 for 2-byte, 32 for 1-byte
    row_align = max(8, 32 // min(in_itemsize, out_itemsize))
    rows = pl.cdiv(max(m, 1), _LANE_W)
    rows8 = _round_up(rows, row_align)

    vmem_cap = _vmem_capacity_bytes()
    # ~24 MiB out-block on 128-MiB v5e/v6e, ~12.8 MiB on 64-MiB v7x.
    out_budget = max(2 << 20, min(24 << 20, vmem_cap // 5))
    out_row_bytes = 2 * n_freqs * _LANE_W * out_itemsize
    tb = max(row_align, (out_budget // out_row_bytes) // row_align * row_align)
    tb = min(tb, rows8)

    # Keep >= 2 grid steps when possible so v7x's two TensorCores both work.
    if rows8 > row_align:
        tb = min(tb, _round_up(pl.cdiv(rows8, 2), row_align))

    # Shrink tb until pad-to-tile waste is small (grid always divides evenly,
    # waste bounded by max(row_align, ~6%) instead of up to tb-1 rows).
    waste_limit = max(row_align, rows8 // 16)
    while tb > row_align and _round_up(rows8, tb) - rows8 > waste_limit:
        tb -= row_align

    rows_pad = _round_up(rows8, tb)
    return tb, rows_pad, vmem_cap


def _pos_embedding_blocks(x, n_freqs, out_dtype=None):
    """Runs the Pallas kernel; returns (y, m) with y: [2F, rows_pad, LANE_W]."""
    n, c = x.shape
    m = n * c
    in_item = jnp.dtype(x.dtype).itemsize
    out_dt = jnp.dtype(out_dtype) if out_dtype is not None else jnp.dtype(x.dtype)
    out_item = out_dt.itemsize

    tb, rows_pad, vmem_cap = _plan_tiles(m, n_freqs, in_item, out_item)
    grid = (rows_pad // tb,)

    x_flat = x.reshape(-1)
    pad = rows_pad * _LANE_W - m
    if pad:
        x_flat = jnp.pad(x_flat, (0, pad))
    x2d = x_flat.reshape(rows_pad, _LANE_W)

    # VMEM limit from 2x in-block + 2x out-block + slack (generation-aware).
    in_block = tb * _LANE_W * in_item
    out_block = 2 * n_freqs * tb * _LANE_W * out_item
    needed = 2 * (in_block + out_block) + (4 << 20)
    vmem_limit = int(min(int(0.9 * vmem_cap), max(32 << 20, needed)))

    n_anchors = (n_freqs + _ANCHOR_EVERY - 1) // _ANCHOR_EVERY
    kernel = functools.partial(_pos_embed_kernel, n_freqs=n_freqs,
                               anchor_every=_ANCHOR_EVERY)

    y = pl.pallas_call(
        kernel,
        out_shape=jax.ShapeDtypeStruct((2 * n_freqs, rows_pad, _LANE_W), out_dt),
        grid_spec=pltpu.PrefetchScalarGridSpec(
            num_scalar_prefetch=0,
            grid=grid,
            in_specs=[pl.BlockSpec((tb, _LANE_W), lambda i: (i, 0))],
            out_specs=pl.BlockSpec((2 * n_freqs, tb, _LANE_W),
                                   lambda i: (0, i, 0)),
        ),
        compiler_params=pltpu.CompilerParams(
            dimension_semantics=("parallel",),   # megacore sharding on v7x
            vmem_limit_bytes=vmem_limit,
        ),
        cost_estimate=pl.CostEstimate(
            flops=m * (12 * n_anchors + 5 * (n_freqs - n_anchors)),
            transcendentals=2 * n_anchors * m,
            bytes_accessed=m * in_item + 2 * n_freqs * m * out_item,
        ),
    )(x2d)
    return y, m


def pos_embedding_freq_major(x, n_freqs, out_dtype=None):
    """Freq-major layout [2*N_freqs, N, C] (no transpose pass).

    y[2k + s, n, c] = (sin if s == 0 else cos)(2**k * x[n, c]).
    Preferred entry point for consumers that can permute their first-layer
    weights (review's recommended fix for the relayout cost).
    """
    n, c = x.shape
    y, m = _pos_embedding_blocks(x, n_freqs, out_dtype)
    return y.reshape(2 * n_freqs, -1)[:, :m].reshape(2 * n_freqs, n, c)


def pos_embedding(x, n_freqs, out_dtype=None):
    """Exact PyTorch layout: [N, 2 * N_freqs * C].

    Note: matching torch's (freq, func)-innermost layout requires one host-side
    relayout pass over the output; use pos_embedding_freq_major to avoid it.
    """
    n, c = x.shape
    y, m = _pos_embedding_blocks(x, n_freqs, out_dtype)
    y = y.reshape(2 * n_freqs, -1)[:, :m]
    return y.reshape(2 * n_freqs, n, c).transpose(1, 0, 2).reshape(
        n, 2 * n_freqs * c)


def pos_embedding_ref(x, n_freqs):
    """Pure-JAX reference mirroring the PyTorch forward."""
    out = []
    for k in range(n_freqs):
        freq = 2.0 ** k
        out.append(jnp.sin(freq * x))
        out.append(jnp.cos(freq * x))
    return jnp.concatenate(out, axis=-1)


if __name__ == "__main__":
    key = jax.random.PRNGKey(0)

    # 1) Small case matching PosEmbedding(N_freqs=4): 128 points, 4 channels.
    N_freqs = 4
    N, C = 128, 4
    x = jax.random.normal(key, (N, C), dtype=jnp.float32)
    out = jax.block_until_ready(pos_embedding(x, N_freqs))
    ref = pos_embedding_ref(x, N_freqs)
    assert out.shape == (N, 2 * N_freqs * C), out.shape
    assert jnp.allclose(out, ref, atol=1e-5, rtol=1e-5)

    # 2) NeRF-like xyz with 10 freqs: exercises padding + recurrence accuracy.
    k2 = jax.random.PRNGKey(1)
    x2 = jax.random.normal(k2, (1000, 3), dtype=jnp.float32)
    out2 = jax.block_until_ready(pos_embedding(x2, 10))
    ref2 = pos_embedding_ref(x2, 10)
    assert out2.shape == (1000, 2 * 10 * 3), out2.shape
    assert jnp.allclose(out2, ref2, atol=1e-5, rtol=1e-5)

    # 3) Medium case that produces a multi-step grid (grid >= 2) and a padded
    #    final tile, plus the freq-major entry point.
    k3 = jax.random.PRNGKey(2)
    x3 = jax.random.normal(k3, (3000, 3), dtype=jnp.float32)
    out3 = jax.block_until_ready(pos_embedding(x3, 6))
    ref3 = pos_embedding_ref(x3, 6)
    assert out3.shape == (3000, 2 * 6 * 3), out3.shape
    assert jnp.allclose(out3, ref3, atol=1e-5, rtol=1e-5)

    fm = jax.block_until_ready(pos_embedding_freq_major(x3, 6))
    assert fm.shape == (2 * 6, 3000, 3), fm.shape
    assert jnp.allclose(fm.transpose(1, 0, 2).reshape(3000, 36), ref3,
                        atol=1e-5, rtol=1e-5)

    print("KERNEL_OK")
</pallas_src>

<mosaic_0001>
module attributes {stable_mosaic.version = 11 : i64} {
  func.func @_pos_embed_kernel(%arg0: i32, %arg1: memref<8x512xf32, #tpu.memory_space<vmem>>, %arg2: memref<8x8x512xf32, #tpu.memory_space<vmem>>) attributes {dimension_semantics = [#tpu.dimension_semantics<parallel>], iteration_bounds = array<i64: 1>, scalar_prefetch = 0 : i64, scratch_operands = 0 : i64, tpu.core_type = #tpu.core_type<tc>, window_params = [{transform_indices = @transform_0, window_bounds = array<i64: 8, 512>}, {transform_indices = @transform_1, window_bounds = array<i64: 8, 8, 512>}]} {
    %c0 = arith.constant 0 : index
    %c0_0 = arith.constant 0 : index
    %0 = vector.load %arg1[%c0, %c0_0] : memref<8x512xf32, #tpu.memory_space<vmem>>, vector<8x512xf32>
    %cst = arith.constant 1.000000e+00 : f32
    %1 = vector.broadcast %cst : f32 to vector<8x512xf32>
    %2 = arith.mulf %1, %0 : vector<8x512xf32>
    %3 = math.sin %2 : vector<8x512xf32>
    %4 = math.cos %2 : vector<8x512xf32>
    %c0_1 = arith.constant 0 : index
    %c0_2 = arith.constant 0 : index
    %c0_3 = arith.constant 0 : index
    %5 = vector.load %arg2[%c0_1, %c0_2, %c0_3] : memref<8x8x512xf32, #tpu.memory_space<vmem>>, vector<1x8x512xf32>
    %6 = vector.shape_cast %5 : vector<1x8x512xf32> to vector<8x512xf32>
    %7 = vector.shape_cast %3 : vector<8x512xf32> to vector<1x8x512xf32>
    tpu.vector_store %arg2[%c0_1, %c0_2, %c0_3], %7 {strides = array<i32>} : memref<8x8x512xf32, #tpu.memory_space<vmem>>, vector<1x8x512xf32>,
    %c1 = arith.constant 1 : index
    %c0_4 = arith.constant 0 : index
    %c0_5 = arith.constant 0 : index
    %8 = vector.load %arg2[%c1, %c0_4, %c0_5] : memref<8x8x512xf32, #tpu.memory_space<vmem>>, vector<1x8x512xf32>
    %9 = vector.shape_cast %8 : vector<1x8x512xf32> to vector<8x512xf32>
    %10 = vector.shape_cast %4 : vector<8x512xf32> to vector<1x8x512xf32>
    tpu.vector_store %arg2[%c1, %c0_4, %c0_5], %10 {strides = array<i32>} : memref<8x8x512xf32, #tpu.memory_space<vmem>>, vector<1x8x512xf32>,
    %cst_6 = arith.constant 2.000000e+00 : f32
    %11 = vector.broadcast %cst_6 : f32 to vector<8x512xf32>
    %12 = arith.mulf %11, %3 : vector<8x512xf32>
    %13 = arith.mulf %12, %4 : vector<8x512xf32>
    %cst_7 = arith.constant 2.000000e+00 : f32
    %14 = vector.broadcast %cst_7 : f32 to vector<8x512xf32>
    %15 = arith.mulf %14, %3 : vector<8x512xf32>
    %16 = arith.mulf %15, %3 : vector<8x512xf32>
    %cst_8 = arith.constant 1.000000e+00 : f32
    %17 = vector.broadcast %cst_8 : f32 to vector<8x512xf32>
    %18 = arith.subf %17, %16 : vector<8x512xf32>
    %c2 = arith.constant 2 : index
    %c0_9 = arith.constant 0 : index
    %c0_10 = arith.constant 0 : index
    %19 = vector.load %arg2[%c2, %c0_9, %c0_10] : memref<8x8x512xf32, #tpu.memory_space<vmem>>, vector<1x8x512xf32>
    %20 = vector.shape_cast %19 : vector<1x8x512xf32> to vector<8x512xf32>
    %21 = vector.shape_cast %13 : vector<8x512xf32> to vector<1x8x512xf32>
    tpu.vector_store %arg2[%c2, %c0_9, %c0_10], %21 {strides = array<i32>} : memref<8x8x512xf32, #tpu.memory_space<vmem>>, vector<1x8x512xf32>,
    %c3 = arith.constant 3 : index
    %c0_11 = arith.constant 0 : index
    %c0_12 = arith.constant 0 : index
    %22 = vector.load %arg2[%c3, %c0_11, %c0_12] : memref<8x8x512xf32, #tpu.memory_space<vmem>>, vector<1x8x512xf32>
    %23 = vector.shape_cast %22 : vector<1x8x512xf32> to vector<8x512xf32>
    %24 = vector.shape_cast %18 : vector<8x512xf32> to vector<1x8x512xf32>
    tpu.vector_store %arg2[%c3, %c0_11, %c0_12], %24 {strides = array<i32>} : memref<8x8x512xf32, #tpu.memory_space<vmem>>, vector<1x8x512xf32>,
    %cst_13 = arith.constant 2.000000e+00 : f32
    %25 = vector.broadcast %cst_13 : f32 to vector<8x512xf32>
    %26 = arith.mulf %25, %13 : vector<8x512xf32>
    %27 = arith.mulf %26, %18 : vector<8x512xf32>
    %cst_14 = arith.constant 2.000000e+00 : f32
    %28 = vector.broadcast %cst_14 : f32 to vector<8x512xf32>
    %29 = arith.mulf %28, %13 : vector<8x512xf32>
    %30 = arith.mulf %29, %13 : vector<8x512xf32>
    %cst_15 = arith.constant 1.000000e+00 : f32
    %31 = vector.broadcast %cst_15 : f32 to vector<8x512xf32>
    %32 = arith.subf %31, %30 : vector<8x512xf32>
    %c4 = arith.constant 4 : index
    %c0_16 = arith.constant 0 : index
    %c0_17 = arith.constant 0 : index
    %33 = vector.load %arg2[%c4, %c0_16, %c0_17] : memref<8x8x512xf32, #tpu.memory_space<vmem>>, vector<1x8x512xf32>
    %34 = vector.shape_cast %33 : vector<1x8x512xf32> to vector<8x512xf32>
    %35 = vector.shape_cast %27 : vector<8x512xf32> to vector<1x8x512xf32>
    tpu.vector_store %arg2[%c4, %c0_16, %c0_17], %35 {strides = array<i32>} : memref<8x8x512xf32, #tpu.memory_space<vmem>>, vector<1x8x512xf32>,
    %c5 = arith.constant 5 : index
    %c0_18 = arith.constant 0 : index
    %c0_19 = arith.constant 0 : index
    %36 = vector.load %arg2[%c5, %c0_18, %c0_19] : memref<8x8x512xf32, #tpu.memory_space<vmem>>, vector<1x8x512xf32>
    %37 = vector.shape_cast %36 : vector<1x8x512xf32> to vector<8x512xf32>
    %38 = vector.shape_cast %32 : vector<8x512xf32> to vector<1x8x512xf32>
    tpu.vector_store %arg2[%c5, %c0_18, %c0_19], %38 {strides = array<i32>} : memref<8x8x512xf32, #tpu.memory_space<vmem>>, vector<1x8x512xf32>,
    %cst_20 = arith.constant 8.000000e+00 : f32
    %39 = vector.broadcast %cst_20 : f32 to vector<8x512xf32>
    %40 = arith.mulf %39, %0 : vector<8x512xf32>
    %41 = math.sin %40 : vector<8x512xf32>
    %42 = math.cos %40 : vector<8x512xf32>
    %c6 = arith.constant 6 : index
    %c0_21 = arith.constant 0 : index
    %c0_22 = arith.constant 0 : index
    %43 = vector.load %arg2[%c6, %c0_21, %c0_22] : memref<8x8x512xf32, #tpu.memory_space<vmem>>, vector<1x8x512xf32>
    %44 = vector.shape_cast %43 : vector<1x8x512xf32> to vector<8x512xf32>
    %45 = vector.shape_cast %41 : vector<8x512xf32> to vector<1x8x512xf32>
    tpu.vector_store %arg2[%c6, %c0_21, %c0_22], %45 {strides = array<i32>} : memref<8x8x512xf32, #tpu.memory_space<vmem>>, vector<1x8x512xf32>,
    %c7 = arith.constant 7 : index
    %c0_23 = arith.constant 0 : index
    %c0_24 = arith.constant 0 : index
    %46 = vector.load %arg2[%c7, %c0_23, %c0_24] : memref<8x8x512xf32, #tpu.memory_space<vmem>>, vector<1x8x512xf32>
    %47 = vector.shape_cast %46 : vector<1x8x512xf32> to vector<8x512xf32>
    %48 = vector.shape_cast %42 : vector<8x512xf32> to vector<1x8x512xf32>
    tpu.vector_store %arg2[%c7, %c0_23, %c0_24], %48 {strides = array<i32>} : memref<8x8x512xf32, #tpu.memory_space<vmem>>, vector<1x8x512xf32>,
    return
  }
  func.func @transform_0(%arg0: i32) -> (i32, i32) {
    %c0_i32 = arith.constant 0 : i32
    %c0_i32_0 = arith.constant 0 : i32
    return %arg0, %c0_i32 : i32, i32
  }
  func.func @transform_1(%arg0: i32) -> (i32, i32, i32) {
    %c0_i32 = arith.constant 0 : i32
    %c0_i32_0 = arith.constant 0 : i32
    %c0_i32_1 = arith.constant 0 : i32
    return %c0_i32, %arg0, %c0_i32_0 : i32, i32, i32
  }
}

</mosaic_0001>

<bundles_post_ra>
// kernel: tpu_custom_call.1
= control target key start
LH: loop header
LB: loop body
LE: loop exit
PB: predicated region body
PF: predicated region fallthrough
CT: control target
= control target key end

     0   :  { %6 = vsyncpa [#allocation3], 0  ;;  %s3770_s0 = inlined_call_operand.hbm [shape: f32[8,512], index: 0, kind: input, shape index: {}]   ;;  %s3771_s1 = inlined_call_operand.hbm [shape: f32[8,8,512], index: 1, kind: output, shape index: {}]  }
   0x1   :  { %7 = vsyncpa [#allocation4], 0  ;;  %s13_s8 = sshll.u32 %s3770_s0, 4  ;;  %s2707_s9 = smov [#allocation2]   ;;  %s14_s8 = int_to_ptr.hbm [resolvable:$true] %s13_s8 }
   0x2   :  { %s15_s10 = sshll.u32 %s2707_s9, 4  ;;  %s16_s10 = int_to_ptr.vmem [resolvable:$true] %s15_s10 }
   0x3   :  { %18 = dma.hbm_to_vmem [thread:$0]  %s14_s8, 512, %s16_s10, [#allocation3]  }
   0x4   :  { %2703 = dma.done.wait [#allocation3], 512  }
   0x5   :  { %2704 = vsyncadd [#allocation3], 4294966784  ;;  %v2731_v0 = vld [vmem:[#allocation2] sm:$0xff]  ;;  %v2733_v1 = vld [vmem:[#allocation2 + $0x8] sm:$0xff]  ;;  %v2708_v28 = vmov 683565275  }
   0x6   :  { %v2735_v2 = vld [vmem:[#allocation2 + $0x10] sm:$0xff]  ;;  %v27_v3 = vand.u32 2147483647, %v2731_v0  ;;  %v30_v4 = vand.u32 2139095040, %v2731_v0  ;;  %v182_v5 = vand.u32 2147483647, %v2733_v1 }
   0x7   :  { %v185_v6 = vand.u32 2139095040, %v2733_v1  ;;  %v340_v7 = vand.u32 2139095040, %v2735_v2  ;;  %v2709_v30 = vmov 2475754826   ;;  %v3779_v32 = vmov 2131351028  }
   0x8   :  { %v31_v8 = vshrl.u32 %v30_v4, 23  ;;  %v34_v9 = vand.u32 8388607, %v27_v3  ;;  %v189_v11 = vand.u32 8388607, %v182_v5  ;;  %s2715_s0 = smov [#allocation5]  }
   0x9   :  { %v186_v10 = vshrl.u32 %v185_v6, 23  ;;  %v341_v15 = vshrl.u32 %v340_v7, 23  ;;  %v3777_v34 = vmov 2102212464   ;;  %v3775_v36 = vmov 920167782  }
   0xa   :  { %v2593_v12 = vadd.s32 4294967169, %v31_v8  ;;  %v35_v13 = vor.u32 8388608, %v34_v9  ;;  %v190_v17 = vor.u32 8388608, %v189_v11  ;;  %v3773_v45 = vmov 1326507024   ;;  %s2578_s11 = sshll.u32 %s2715_s0, 4  ;;  %s2579_s11 = int_to_ptr.vmem [resolvable:$true] %s2578_s11 }
   0xb   :  { %v2596_v14 = vadd.s32 4294967169, %v186_v10  ;;  %v2599_v21 = vadd.s32 4294967169, %v341_v15  ;;  %s2580_s14 = sshll.u32 %s3771_s1, 4  ;;  %s2716_s15 = smov 512   ;;  %s2581_s14 = int_to_ptr.hbm [resolvable:$true] %s2580_s14 }
   0xc   :  { %v37_v16 = vadd.s32 1, %v2593_v12  ;;  %v2746_v20 = vshll.u32 %v35_v13, 8  ;;  %v2752_v26 = vshll.u32 %v190_v17, 8  ;;  %s2717_s16 = smov 32  }
   0xd   :  { %v192_v18 = vadd.s32 1, %v2596_v14  ;;  %v2760_v39 = vadd.s32 1, %v2599_v21 }
   0xe   :  { %vm38_vm0 = vcmp.gt.s32.totalorder %v37_v16, 0  ;;  %v76_v38 = vand.u32 65535, %v2746_v20  ;;  %v77_v43 = vshrl.u32 %v2746_v20, 16 }
   0xf   :  { %v39_v19 = vsel %vm38_vm0, %v37_v16, 0  ;;  %vm193_vm1 = vcmp.gt.s32.totalorder %v192_v18, 0  ;;  %vm348_vm15 = vcmp.gt.s32.totalorder %v2760_v39, 0 }
  0x10   :  { %v41_v22 = vand.u32 31, %v39_v19  ;;  %v194_v23 = vsel %vm193_vm1, %v192_v18, 0  ;;  %v2748_v24 = vshrl.u32 %v39_v19, 5 }
  0x11   :  { %v2750_v25 = vand.u32 31, %v194_v23  ;;  %v2780_v56 = vshrl.u32 %v194_v23, 5 }
  0x12   :  { %v42_v27 = vsub.s32 32, %v41_v22  ;;  %v44_v29 = vshll.u32 %v2708_v28, %v41_v22  ;;  %v47_v31 = vshll.u32 %v2709_v30, %v41_v22  ;;  %v50_v33 = vshll.u32 %v3779_v32, %v41_v22 }
  0x13   :  { %v53_v35 = vshll.u32 %v3777_v34, %v41_v22  ;;  %v56_v37 = vshll.u32 %v3775_v36, %v41_v22  ;;  %vm59_vm2 = vcmp.lt.s32.totalorder %v2748_v24, 1  ;;  %vm62_vm3 = vcmp.lt.s32.totalorder %v2748_v24, 4 }
  0x14   :  { %v45_v40 = vshrl.u32 %v2709_v30, %v42_v27  ;;  %v48_v41 = vshrl.u32 %v3779_v32, %v42_v27  ;;  %v51_v42 = vshrl.u32 %v3777_v34, %v42_v27  ;;  %v54_v44 = vshrl.u32 %v3775_v36, %v42_v27 }
  0x15   :  { %v57_v46 = vshrl.u32 %v3773_v45, %v42_v27  ;;  %v2771_v50 = vsub.s32 32, %v2750_v25  ;;  %v43_v51 = vshrl.u32 %v2708_v28, %v42_v27  ;;  %vm61_vm4 = vcmp.lt.s32.totalorder %v2748_v24, 3 }
  0x16   :  { %v46_v47 = vor.u32 %v45_v40, %v44_v29  ;;  %v49_v48 = vor.u32 %v48_v41, %v47_v31  ;;  %v52_v49 = vor.u32 %v51_v42, %v50_v33  ;;  %v55_v52 = vor.u32 %v54_v44, %v53_v35 }
  0x17   :  { %v58_v53 = vor.u32 %v57_v46, %v56_v37  ;;  %vm60_vm5 = vcmp.lt.s32.totalorder %v2748_v24, 2  ;;  %v199_v59 = vshll.u32 %v2708_v28, %v2750_v25  ;;  %v202_v60 = vshll.u32 %v2709_v30, %v2750_v25 }
  0x18   :  { %v67_v54 = vsel %vm59_vm2, %v46_v47, %v49_v48  ;;  %v71_v55 = vsel %vm59_vm2, %v49_v48, %v52_v49  ;;  %v68_v57 = vsel %vm62_vm3, %v55_v52, 920167782  ;;  %v64_v61 = vsel %vm62_vm3, %v52_v49, 2102212464 }
  0x19   :  { %v72_v58 = vsel %vm62_vm3, %v58_v53, 1326507024  ;;  %v69_v62 = vsel %vm61_vm4, %v52_v49, %v68_v57  ;;  %v200_v4 = vshrl.u32 %v2709_v30, %v2771_v50  ;;  %v63_v6 = vsel %vm59_vm2, %v43_v51, %v46_v47 }
  0x1a   :  { %v73_v63 = vsel %vm61_vm4, %v55_v52, %v72_v58  ;;  %v70_v7 = vsel %vm60_vm5, %v67_v54, %v69_v62  ;;  %v203_v9 = vshrl.u32 %v3779_v32, %v2771_v50  ;;  %v65_v14 = vsel %vm61_vm4, %v49_v48, %v64_v61 }
  0x1b   :  { %v74_v8 = vsel %vm60_vm5, %v71_v55, %v73_v63  ;;  %v100_v12 = vand.u32 65535, %v70_v7  ;;  %v101_v13 = vshrl.u32 %v70_v7, 16  ;;  %v2808_v15 = vor.u32 %v200_v4, %v199_v59 }
  0x1c   :  { %v78_v10 = vand.u32 65535, %v74_v8  ;;  %v79_v11 = vshrl.u32 %v74_v8, 16  ;;  %v2810_v16 = vor.u32 %v203_v9, %v202_v60  ;;  %v205_v17 = vshll.u32 %v3779_v32, %v2750_v25 }
  0x1d   :  { %v206_v22 = vshrl.u32 %v3777_v34, %v2771_v50  ;;  %v102_v27 = vmul.u32 %v100_v12, %v76_v38  ;;  %v103_v29 = vmul.u32 %v101_v13, %v76_v38  ;;  %v104_v31 = vmul.u32 %v100_v12, %v77_v43 }
  0x1e   :  { %v80_v18 = vmul.u32 %v78_v10, %v76_v38  ;;  %v81_v19 = vmul.u32 %v79_v11, %v76_v38  ;;  %v82_v21 = vmul.u32 %v78_v10, %v77_v43  ;;  %v83_v23 = vmul.u32 %v79_v11, %v77_v43 }
  0x1f   :  { %v105_v40 = vmul.u32 %v101_v13, %v77_v43  ;;  %v106_v42 = vshll.u32 %v103_v29, 16  ;;  %v107_v44 = vshrl.u32 %v103_v29, 16  ;;  %v108_v46 = vshll.u32 %v104_v31, 16 }
  0x20   :  { %v84_v33 = vshll.u32 %v81_v19, 16  ;;  %v85_v35 = vshrl.u32 %v81_v19, 16  ;;  %v86_v37 = vshll.u32 %v82_v21, 16  ;;  %v87_v41 = vshrl.u32 %v82_v21, 16 }
  0x21   :  { %v109_v48 = vshrl.u32 %v104_v31, 16  ;;  %v208_v49 = vshll.u32 %v3777_v34, %v2750_v25  ;;  %v2714_v51 = vmov 0   ;;  %vm110_vm7 = vc.u32 %v102_v27, %v106_v42 }
  0x22   :  { %vm88_vm6 = vc.u32 %v80_v18, %v84_v33  ;;  %v90_v47 = vadd.s32 %v84_v33, %v80_v18  ;;  %v112_v38 = vadd.s32 %v106_v42, %v102_v27  ;;  %v209_v53 = vshrl.u32 %v3775_v36, %v2771_v50 }
  0x23   :  { %v89_v52 = vsel %vm88_vm6, 1, %v2714_v51  ;;  %v111_v43 = vsel %vm110_vm7, 1, %v2714_v51  ;;  %v211_v55 = vshll.u32 %v3775_v36, %v2750_v25  ;;  %v207_v59 = vor.u32 %v206_v22, %v205_v17 }
  0x24   :  { %v91_v54 = vadd.s32 %v89_v52, %v83_v23  ;;  %vm92_vm8 = vc.u32 %v90_v47, %v86_v37  ;;  %v113_v58 = vadd.s32 %v111_v43, %v105_v40  ;;  %vm114_vm9 = vc.u32 %v112_v38, %v108_v46 }
  0x25   :  { %v93_v57 = vsel %vm92_vm8, 1, %v2714_v51  ;;  %v115_v61 = vsel %vm114_vm9, 1, %v2714_v51  ;;  %v210_v62 = vor.u32 %v209_v53, %v208_v49  ;;  %v212_v63 = vshrl.u32 %v3773_v45, %v2771_v50 }
  0x26   :  { %v95_v60 = vadd.s32 %v93_v57, %v91_v54  ;;  %v2828_v4 = vadd.s32 %v112_v38, %v108_v46  ;;  %v117_v7 = vadd.s32 %v115_v61, %v113_v58  ;;  %vm214_vm10 = vcmp.lt.s32.totalorder %v2780_v56, 1 }
  0x27   :  { %vm216_vm11 = vcmp.lt.s32.totalorder %v2780_v56, 3  ;;  %v213_v8 = vor.u32 %v212_v63, %v211_v55  ;;  %vm215_vm12 = vcmp.lt.s32.totalorder %v2780_v56, 2  ;;  %vm217_vm13 = vcmp.lt.s32.totalorder %v2780_v56, 4 }
  0x28   :  { %v96_v25 = vadd.s32 %v95_v60, %v85_v35  ;;  %v66_v9 = vsel %vm60_vm5, %v63_v6, %v65_v14  ;;  %v118_v10 = vadd.s32 %v117_v7, %v107_v44  ;;  %v222_v11 = vsel %vm214_vm10, %v2808_v15, %v2810_v16 }
  0x29   :  { %v223_v12 = vsel %vm217_vm13, %v210_v62, 920167782  ;;  %v226_v18 = vsel %vm214_vm10, %v2810_v16, %v207_v59  ;;  %v231_v24 = vand.u32 65535, %v2752_v26  ;;  %v227_v19 = vsel %vm217_vm13, %v213_v8, 1326507024 }
  0x2a   :  { %v2842_v13 = vadd.s32 %v96_v25, %v87_v41  ;;  %v224_v17 = vsel %vm216_vm11, %v207_v59, %v223_v12  ;;  %v119_v6 = vadd.s32 %v118_v10, %v109_v48  ;;  %v232_v21 = vshrl.u32 %v2752_v26, 16 }
  0x2b   :  { %v225_v14 = vsel %vm215_vm12, %v222_v11, %v224_v17  ;;  %v120_v22 = vmul.u32 %v2746_v20, %v66_v9  ;;  %v228_v23 = vsel %vm216_vm11, %v210_v62, %v227_v19  ;;  %v198_v35 = vshrl.u32 %v2708_v28, %v2771_v50 }
  0x2c   :  { %vm122_vm14 = vc.u32 %v2842_v13, %v2828_v4  ;;  %v255_v27 = vand.u32 65535, %v225_v14  ;;  %v123_v29 = vadd.s32 1, %v119_v6  ;;  %v229_v31 = vsel %vm215_vm12, %v226_v18, %v228_v23 }
  0x2d   :  { %v256_v33 = vshrl.u32 %v225_v14, 16  ;;  %v233_v37 = vand.u32 65535, %v229_v31  ;;  %v234_v40 = vshrl.u32 %v229_v31, 16  ;;  %v219_v41 = vsel %vm217_vm13, %v207_v59, 2102212464 }
  0x2e   :  { %v124_v20 = vsel %vm122_vm14, %v123_v29, %v119_v6  ;;  %v259_v44 = vmul.u32 %v255_v27, %v232_v21  ;;  %v257_v49 = vmul.u32 %v255_v27, %v231_v24  ;;  %v349_v53 = vsel %vm348_vm15, %v2760_v39, 0 }
  0x2f   :  { %v258_v42 = vmul.u32 %v256_v33, %v231_v24  ;;  %v125_v46 = vadd.s32 %v124_v20, %v120_v22  ;;  %v235_v47 = vmul.u32 %v233_v37, %v231_v24  ;;  %v236_v48 = vmul.u32 %v234_v40, %v231_v24 }
  0x30   :  { %v237_v52 = vmul.u32 %v233_v37, %v232_v21  ;;  %v218_v50 = vsel %vm214_vm10, %v198_v35, %v2808_v15  ;;  %v238_v43 = vmul.u32 %v234_v40, %v232_v21  ;;  %v220_v57 = vsel %vm216_vm11, %v2810_v16, %v219_v41 }
  0x31   :  { %v261_v38 = vshll.u32 %v258_v42, 16  ;;  %v126_v54 = vadd.s32 536870912, %v125_v46  ;;  %v239_v55 = vshll.u32 %v236_v48, 16  ;;  %v260_v59 = vmul.u32 %v256_v33, %v232_v21 }
  0x32   :  { %v241_v58 = vshll.u32 %v237_v52, 16  ;;  %v263_v60 = vshll.u32 %v259_v44, 16  ;;  %v240_v39 = vshrl.u32 %v236_v48, 16  ;;  %v262_v9 = vshrl.u32 %v258_v42, 16 }
  0x33   :  { %v2874_v61 = vshrl.u32 %v126_v54, 30  ;;  %vm243_vm0 = vc.u32 %v235_v47, %v239_v55  ;;  %v245_v62 = vadd.s32 %v239_v55, %v235_v47  ;;  %vm265_vm1 = vc.u32 %v257_v49, %v261_v38 }
  0x34   :  { %v244_v63 = vsel %vm243_vm0, 1, %v2714_v51  ;;  %v266_v7 = vsel %vm265_vm1, 1, %v2714_v51  ;;  %v267_v15 = vadd.s32 %v261_v38, %v257_v49  ;;  %v351_v11 = vand.u32 31, %v349_v53 }
  0x35   :  { %v128_v25 = vshll.u32 %v2874_v61, 30  ;;  %v246_v8 = vadd.s32 %v244_v63, %v238_v43  ;;  %vm247_vm2 = vc.u32 %v245_v62, %v241_v58  ;;  %v268_v10 = vadd.s32 %v266_v7, %v260_v59 }
  0x36   :  { %v248_v16 = vsel %vm247_vm2, 1, %v2714_v51  ;;  %vm269_vm3 = vc.u32 %v267_v15, %v263_v60  ;;  %v242_v17 = vshrl.u32 %v237_v52, 16  ;;  %v264_v6 = vshrl.u32 %v259_v44, 16 }
  0x37   :  { %v129_v12 = vsub.s32 %v125_v46, %v128_v25  ;;  %v250_v18 = vadd.s32 %v248_v16, %v246_v8  ;;  %v270_v24 = vsel %vm269_vm3, 1, %v2714_v51  ;;  %v337_v19 = vand.u32 2147483647, %v2735_v2 }
  0x38   :  { %v272_v14 = vadd.s32 %v270_v24, %v268_v10  ;;  %v2882_v23 = vadd.s32 %v267_v15, %v263_v60  ;;  %v221_v27 = vsel %vm215_vm12, %v218_v50, %v220_v57  ;;  %v352_v31 = vsub.s32 32, %v351_v11 }
  0x39   :  { %vm130_vm4 = vcmp.lt.s32.totalorder %v129_v12, 0  ;;  %v131_v21 = vsub.s32 0, %v129_v12  ;;  %v251_v22 = vadd.s32 %v250_v18, %v240_v39  ;;  %vm29_vm5 = vcmp.lt.s32.totalorder %v2731_v0, 0 }
  0x3a   :  { %v273_v29 = vadd.s32 %v272_v14, %v262_v9  ;;  %v121_v37 = vadd.s32 %v2828_v4, %v2842_v13  ;;  %v344_v41 = vand.u32 8388607, %v337_v19  ;;  %v151_v42 = vsub.s32 4, %v2874_v61 }
  0x3b   :  { %v132_v33 = vsel %vm130_vm4, %v131_v21, %v129_v12  ;;  %v2887_v35 = vadd.s32 %v251_v22, %v242_v17  ;;  %v275_v56 = vmul.u32 %v2752_v26, %v221_v27  ;;  %v2897_v44 = vshrl.u32 %v349_v53, 5 }
  0x3c   :  { %v133_v40 = vclz %v132_v33  ;;  %v274_v20 = vadd.s32 %v273_v29, %v264_v6  ;;  %vm2901_vm7 = vcmp.le.f32.partialorder %v27_v3, 0.7853982  ;;  %v363_v47 = vshll.u32 %v3777_v34, %v351_v11 }
  0x3d   :  { %vm277_vm6 = vc.u32 %v2887_v35, %v2882_v23  ;;  %v364_v48 = vshrl.u32 %v3775_v36, %v352_v31  ;;  %v354_v49 = vshll.u32 %v2708_v28, %v351_v11  ;;  %v355_v26 = vshrl.u32 %v2709_v30, %v352_v31 }
  0x3e   :  { %v2594_v4 = vadd.s32 4294967294, %v133_v40  ;;  %v278_v13 = vadd.s32 1, %v274_v20  ;;  %v357_v52 = vshll.u32 %v2709_v30, %v351_v11  ;;  %v358_v38 = vshrl.u32 %v3779_v32, %v352_v31 }
  0x3f   :  { %v360_v3 = vshll.u32 %v3779_v32, %v351_v11  ;;  %v361_v54 = vshrl.u32 %v3777_v34, %v352_v31  ;;  %v366_v55 = vshll.u32 %v3775_v36, %v351_v11  ;;  %v367_v57 = vshrl.u32 %v3773_v45, %v352_v31 }
  0x40   :  { %vm2595_vm8 = vcmp.lt.s32.totalorder %v2594_v4, 0  ;;  %v279_v53 = vsel %vm277_vm6, %v278_v13, %v274_v20  ;;  %v365_v62 = vor.u32 %v364_v48, %v363_v47  ;;  %v152_v39 = vsel %vm29_vm5, %v151_v42, %v2874_v61 }
  0x41   :  { %v136_v50 = vsel %vm2595_vm8, 0, %v2594_v4  ;;  %v280_v43 = vadd.s32 %v279_v53, %v275_v56  ;;  %v356_v7 = vor.u32 %v355_v26, %v354_v49  ;;  %v359_v15 = vor.u32 %v358_v38, %v357_v52 }
  0x42   :  { %v137_v58 = vsub.s32 32, %v136_v50  ;;  %v138_v59 = vshll.u32 %v129_v12, %v136_v50  ;;  %v141_v60 = vsub.s32 4294967266, %v136_v50  ;;  %v362_v9 = vor.u32 %v361_v54, %v360_v3 }
  0x43   :  { %v281_v63 = vadd.s32 536870912, %v280_v43  ;;  %vm369_vm9 = vcmp.lt.s32.totalorder %v2897_v44, 1  ;;  %v368_v10 = vor.u32 %v367_v57, %v366_v55  ;;  %vm371_vm10 = vcmp.lt.s32.totalorder %v2897_v44, 3 }
  0x44   :  { %v139_v25 = vshrl.u32 %v121_v37, %v137_v58  ;;  %v142_v8 = vadd.s32 127, %v141_v60  ;;  %vm372_vm11 = vcmp.lt.s32.totalorder %v2897_v44, 4  ;;  %v345_v17 = vor.u32 8388608, %v344_v41 }
  0x45   :  { %v2919_v16 = vshrl.u32 %v281_v63, 30  ;;  %v378_v61 = vsel %vm372_vm11, %v365_v62, 920167782  ;;  %v2927_v18 = vsel %vm2901_vm7, 0, %v152_v39  ;;  %vm370_vm12 = vcmp.lt.s32.totalorder %v2897_v44, 2 }
  0x46   :  { %v140_v11 = vor.u32 %v139_v25, %v138_v59  ;;  %v143_v12 = vshll.u32 %v142_v8, 23  ;;  %v377_v21 = vsel %vm369_vm9, %v356_v7, %v359_v15  ;;  %v379_v22 = vsel %vm371_vm10, %v362_v9, %v378_v61 }
  0x47   :  { %v283_v24 = vshll.u32 %v2919_v16, 30  ;;  %v353_v29 = vshrl.u32 %v2708_v28, %v352_v31  ;;  %v381_v33 = vsel %vm369_vm9, %v359_v15, %v362_v9  ;;  %v382_v37 = vsel %vm372_vm11, %v368_v10, 1326507024 }
  0x48   :  { %v144_v6 = vor.u32 4788187, %v143_v12  ;;  %v147_v14 = vcvt.s32.f32 %v140_v11  ;;  %v171_v20 = vadd.s32 3, %v2927_v18  ;;  %v383_v41 = vsel %vm371_vm10, %v365_v62, %v382_v37 }
  0x49   :  { %v2935_v27 = vsub.s32 %v280_v43, %v283_v24  ;;  %v2945_v42 = vshll.u32 %v345_v17, 8  ;;  %v380_v31 = vsel %vm370_vm12, %v377_v21, %v379_v22  ;;  %v384_v4 = vsel %vm370_vm12, %v381_v33, %v383_v41 }
  0x4a   :  { %v145_v40 = vand.u32 2147483647, %v144_v6  ;;  %v388_v49 = vand.u32 65535, %v384_v4  ;;  %v276_v26 = vadd.s32 %v2882_v23, %v2887_v35  ;;  %v389_v38 = vshrl.u32 %v384_v4, 16 }
  0x4b   :  { %vm285_vm13 = vcmp.lt.s32.totalorder %v2935_v27, 0  ;;  %v286_v56 = vsub.s32 0, %v2935_v27  ;;  %v386_v47 = vand.u32 65535, %v2945_v42  ;;  %v387_v48 = vshrl.u32 %v2945_v42, 16 }
  0x4c   :  { %v148_v13 = vmul.f32 %v147_v14, %v145_v40  ;;  %v2958_v3 = vand.u32 3, %v171_v20  ;;  %vm184_vm14 = vcmp.lt.s32.totalorder %v2733_v1, 0  ;;  %v374_v43 = vsel %vm372_vm11, %v362_v9, 2102212464 }
  0x4d   :  { %v287_v52 = vsel %vm285_vm13, %v286_v56, %v2935_v27  ;;  %v2961_v50 = vmul.u32 %v388_v49, %v387_v48  ;;  %v390_v55 = vmul.u32 %v388_v49, %v386_v47  ;;  %v391_v57 = vmul.u32 %v389_v38, %v386_v47 }
  0x4e   :  { %v149_v53 = vxor.u32 2147483648, %v148_v13  ;;  %v288_v54 = vclz %v287_v52  ;;  %v411_v58 = vshrl.u32 %v380_v31, 16  ;;  %v306_v59 = vsub.s32 4, %v2919_v16 }
  0x4f   :  { %v373_v60 = vsel %vm369_vm9, %v353_v29, %v356_v7  ;;  %v394_v39 = vshll.u32 %v391_v57, 16  ;;  %v396_v63 = vshll.u32 %v2961_v50, 16  ;;  %v410_v25 = vand.u32 65535, %v380_v31 }
  0x50   :  { %v150_v23 = vsel %vm29_vm5, %v149_v53, %v148_v13  ;;  %v2597_v35 = vadd.s32 4294967294, %v288_v54  ;;  %vm2980_vm15 = vcmp.le.f32.partialorder %v182_v5, 0.7853982  ;;  %v375_v7 = vsel %vm371_vm10, %v359_v15, %v374_v43 }
  0x51   :  { %v2973_v62 = vsel %vm2901_vm7, %v2731_v0, %v150_v23  ;;  %v393_v46 = vmul.u32 %v389_v38, %v387_v48  ;;  %vm398_vm1 = vc.u32 %v390_v55, %v394_v39  ;;  %v400_v11 = vadd.s32 %v394_v39, %v390_v55 }
  0x52   :  { %v155_v8 = vmul.f32 %v2973_v62, %v2973_v62  ;;  %vm2598_vm0 = vcmp.lt.s32.totalorder %v2597_v35, 0  ;;  %v2986_v12 = vmul.u32 %v411_v58, %v386_v47  ;;  %v399_v5 = vsel %vm398_vm1, 1, %v2714_v51 }
  0x53   :  { %v291_v10 = vsel %vm2598_vm0, 0, %v2597_v35  ;;  %vm402_vm2 = vc.u32 %v400_v11, %v396_v63  ;;  %v2990_v21 = vmul.u32 %v410_v25, %v387_v48  ;;  %v401_v33 = vadd.s32 %v399_v5, %v393_v46  ;;  %v3008_v35 = vld [vmem:[#allocation2 + $0x18] sm:$0xff] }
  0x54   :  { %v156_v17 = vmul.f32 -0.001358992, %v155_v8  ;;  %v163_v61 = vmul.f32 -0.00019511016, %v155_v8  ;;  %v292_v24 = vsub.s32 32, %v291_v10  ;;  %v293_v6 = vshll.u32 %v2935_v27, %v291_v10 }
  0x55   :  { %v296_v14 = vsub.s32 4294967266, %v291_v10  ;;  %vm177_vm3 = vcmp.eq.s32.totalorder %v2958_v3, 2  ;;  %v307_v40 = vsel %vm184_vm14, %v306_v59, %v2919_v16  ;;  %v395_v20 = vshrl.u32 %v391_v57, 16 }
  0x56   :  { %v157_v22 = vadd.f32 0.041655596, %v156_v17  ;;  %v164_v29 = vadd.f32 0.008332121, %v163_v61  ;;  %v294_v15 = vshrl.u32 %v276_v26, %v292_v24  ;;  %v412_v41 = vmul.u32 %v410_v25, %v386_v47 }
  0x57   :  { %v297_v37 = vadd.s32 127, %v296_v14  ;;  %v403_v4 = vsel %vm402_vm2, 1, %v2714_v51  ;;  %vm174_vm4 = vcmp.eq.s32.totalorder %v2958_v3, 0  ;;  %v415_v26 = vmul.u32 %v411_v58, %v387_v48 }
  0x58   :  { %v158_v27 = vmul.f32 %v157_v22, %v155_v8  ;;  %v165_v56 = vmul.f32 %v164_v29, %v155_v8  ;;  %v295_v31 = vor.u32 %v294_v15, %v293_v6  ;;  %v405_v49 = vadd.s32 %v403_v4, %v401_v33 }
  0x59   :  { %v298_v13 = vshll.u32 %v297_v37, 23  ;;  %v416_v52 = vshll.u32 %v2986_v12, 16  ;;  %vm173_vm5 = vcmp.lt.s32.totalorder %v2958_v3, 2  ;;  %v376_v16 = vsel %vm370_vm12, %v373_v60, %v375_v7 }
  0x5a   :  { %v159_v38 = vadd.f32 -0.4999988, %v158_v27  ;;  %v166_v53 = vadd.f32 -0.16666654, %v165_v56  ;;  %v418_v47 = vshll.u32 %v2990_v21, 16  ;;  %v302_v43 = vcvt.s32.f32 %v295_v31 }
  0x5b   :  { %v299_v54 = vor.u32 4788187, %v298_v13  ;;  %v3005_v55 = vsel %vm2980_vm15, 0, %v307_v40  ;;  %vm420_vm6 = vc.u32 %v412_v41, %v416_v52  ;;  %v422_v23 = vadd.s32 %v416_v52, %v412_v41 }
  0x5c   :  { %v160_v57 = vmul.f32 %v159_v38, %v155_v8  ;;  %v167_v48 = vmul.f32 %v166_v53, %v155_v8  ;;  %v421_v58 = vsel %vm420_vm6, 1, %v2714_v51  ;;  %v397_v44 = vshrl.u32 %v2961_v50, 16 }
  0x5d   :  { %v300_v59 = vand.u32 2147483647, %v299_v54  ;;  %v406_v60 = vadd.s32 %v405_v49, %v395_v20  ;;  %v423_v39 = vadd.s32 %v421_v58, %v415_v26  ;;  %v417_v7 = vshrl.u32 %v2986_v12, 16 }
  0x5e   :  { %v3011_v63 = vadd.f32 1.0, %v160_v57  ;;  %v168_v25 = vadd.f32 1.0, %v167_v48  ;;  %vm424_vm7 = vc.u32 %v422_v23, %v418_v47  ;;  %v326_v10 = vadd.s32 3, %v3005_v55 }
  0x5f   :  { %v303_v46 = vmul.f32 %v302_v43, %v300_v59  ;;  %v425_v8 = vsel %vm424_vm7, 1, %v2714_v51  ;;  %v495_v11 = vand.u32 2139095040, %v3008_v35  ;;  %v419_v61 = vshrl.u32 %v2990_v21, 16 }
  0x60   :  { %v3018_v17 = vmul.f32 %v168_v25, %v2973_v62  ;;  %v178_v50 = vxor.u32 2147483648, %v3011_v63  ;;  %v427_v24 = vadd.s32 %v425_v8, %v423_v39  ;;  %v3022_v14 = vadd.s32 %v406_v60, %v397_v44 }
  0x61   :  { %v304_v6 = vxor.u32 2147483648, %v303_v46  ;;  %v3024_v12 = vadd.s32 %v422_v23, %v418_v47  ;;  %v496_v5 = vshrl.u32 %v495_v11, 23  ;;  %v492_v15 = vand.u32 2147483647, %v3008_v35 }
  0x62   :  { %v175_v22 = vxor.u32 2147483648, %v3018_v17  ;;  %v179_v62 = vsel %vm177_vm3, %v178_v50, %v3018_v17  ;;  %v428_v29 = vadd.s32 %v427_v24, %v417_v7  ;;  %vm170_vm8 = vweird.f32 %v2731_v0 }
  0x63   :  { %v305_v21 = vsel %vm184_vm14, %v304_v6, %v303_v46  ;;  %v2602_v33 = vadd.s32 4294967169, %v496_v5  ;;  %v430_v41 = vmul.u32 %v2945_v42, %v376_v16  ;;  %vm432_vm9 = vc.u32 %v3022_v14, %v3024_v12 }
  0x64   :  { %v176_v37 = vsel %vm174_vm4, %v3011_v63, %v175_v22  ;;  %v308_v40 = vsel %vm2980_vm15, %v2733_v1, %v305_v21  ;;  %v429_v20 = vadd.s32 %v428_v29, %v419_v61  ;;  %v3053_v13 = vand.u32 3, %v326_v10 }
  0x65   :  { %v180_v27 = vsel %vm173_vm5, %v176_v37, %v179_v62  ;;  %v310_v56 = vmul.f32 %v308_v40, %v308_v40  ;;  %v502_v31 = vadd.s32 1, %v2602_v33  ;;  %v499_v9 = vand.u32 8388607, %v492_v15 }
  0x66   :  { %v3051_v4 = vsel %vm170_vm8, nan, %v180_v27  ;;  %v433_v49 = vadd.s32 1, %v429_v20  ;;  %vm332_vm11 = vcmp.eq.s32.totalorder %v3053_v13, 2  ;;  %vm329_vm12 = vcmp.eq.s32.totalorder %v3053_v13, 0 }
  0x67   :  { %1263 = vst [vmem:[#allocation5] sm:$0xff] %v3051_v4  ;;  %v311_v42 = vmul.f32 -0.001358992, %v310_v56  ;;  %v318_v3 = vmul.f32 -0.00019511016, %v310_v56  ;;  %vm503_vm10 = vcmp.gt.s32.totalorder %v502_v31, 0  ;;  %vm325_vm14 = vweird.f32 %v2733_v1 }
  0x68   :  { %v434_v26 = vsel %vm432_vm9, %v433_v49, %v429_v20  ;;  %v504_v52 = vsel %vm503_vm10, %v502_v31, 0  ;;  %v500_v48 = vor.u32 8388608, %v499_v9  ;;  %vm328_vm13 = vcmp.lt.s32.totalorder %v3053_v13, 2 }
  0x69   :  { %v312_v38 = vadd.f32 0.041655596, %v311_v42  ;;  %v319_v53 = vadd.f32 0.008332121, %v318_v3  ;;  %v435_v16 = vadd.s32 %v434_v26, %v430_v41  ;;  %v506_v47 = vand.u32 31, %v504_v52 }
  0x6a   :  { %v3060_v58 = vshrl.u32 %v504_v52, 5  ;;  %v3080_v5 = vmul.f32 8.0, %v2731_v0  ;;  %v3087_v21 = vshll.u32 %v500_v48, 8  ;;  %vm339_vm4 = vcmp.lt.s32.totalorder %v2735_v2, 0 }
  0x6b   :  { %v313_v54 = vmul.f32 %v312_v38, %v310_v56  ;;  %v320_v43 = vmul.f32 %v319_v53, %v310_v56  ;;  %v436_v57 = vadd.s32 536870912, %v435_v16  ;;  %v3062_v23 = vsub.s32 32, %v506_v47 }
  0x6c   :  { %v509_v59 = vshll.u32 %v2708_v28, %v506_v47  ;;  %v512_v44 = vshll.u32 %v2709_v30, %v506_v47  ;;  %v515_v7 = vshll.u32 %v3779_v32, %v506_v47  ;;  %v518_v11 = vshll.u32 %v3777_v34, %v506_v47 }
  0x6d   :  { %v314_v60 = vadd.f32 -0.4999988, %v313_v54  ;;  %v321_v39 = vadd.f32 -0.16666654, %v320_v43  ;;  %v3067_v25 = vshrl.u32 %v436_v57, 30  ;;  %v510_v46 = vshrl.u32 %v2709_v30, %v3062_v23 }
  0x6e   :  { %v513_v10 = vshrl.u32 %v3779_v32, %v3062_v23  ;;  %v516_v8 = vshrl.u32 %v3777_v34, %v3062_v23  ;;  %v519_v29 = vshrl.u32 %v3775_v36, %v3062_v23  ;;  %vm524_vm15 = vcmp.lt.s32.totalorder %v3060_v58, 1 }
  0x6f   :  { %v315_v61 = vmul.f32 %v314_v60, %v310_v56  ;;  %v322_v24 = vmul.f32 %v321_v39, %v310_v56  ;;  %v438_v6 = vshll.u32 %v3067_v25, 30  ;;  %v3082_v62 = vor.u32 %v510_v46, %v509_v59 }
  0x70   :  { %v3091_v41 = vor.u32 %v513_v10, %v512_v44  ;;  %v517_v27 = vor.u32 %v516_v8, %v515_v7  ;;  %v520_v56 = vor.u32 %v519_v29, %v518_v11  ;;  %v521_v31 = vshll.u32 %v3775_v36, %v506_v47 }
  0x71   :  { %v3089_v33 = vadd.f32 1.0, %v315_v61  ;;  %v323_v37 = vadd.f32 1.0, %v322_v24  ;;  %v439_v20 = vsub.s32 %v435_v16, %v438_v6  ;;  %v522_v49 = vshrl.u32 %v3773_v45, %v3062_v23 }
  0x72   :  { %vm526_vm1 = vcmp.lt.s32.totalorder %v3060_v58, 3  ;;  %vm527_vm2 = vcmp.lt.s32.totalorder %v3060_v58, 4  ;;  %v3772_v26 = vand.u32 2147483647, %v3080_v5  ;;  %v1331_v52 = vand.u32 2139095040, %v3080_v5 }
  0x73   :  { %v3096_v9 = vmul.f32 %v323_v37, %v308_v40  ;;  %v333_v42 = vxor.u32 2147483648, %v3089_v33  ;;  %vm440_vm0 = vcmp.lt.s32.totalorder %v439_v20, 0  ;;  %v441_v3 = vsub.s32 0, %v439_v20 }
  0x74   :  { %v523_v16 = vor.u32 %v522_v49, %v521_v31  ;;  %vm525_vm3 = vcmp.lt.s32.totalorder %v3060_v58, 2  ;;  %v532_v54 = vsel %vm524_vm15, %v3082_v62, %v3091_v41  ;;  %v533_v43 = vsel %vm527_vm2, %v520_v56, 920167782 }
  0x75   :  { %v330_v38 = vxor.u32 2147483648, %v3096_v9  ;;  %v334_v40 = vsel %vm332_vm11, %v333_v42, %v3096_v9  ;;  %v442_v53 = vsel %vm440_vm0, %v441_v3, %v439_v20  ;;  %v534_v48 = vsel %vm526_vm1, %v517_v27, %v533_v43 }
  0x76   :  { %v443_v47 = vclz %v442_v53  ;;  %v541_v59 = vand.u32 65535, %v3087_v21  ;;  %vm3129_vm5 = vcmp.le.f32.partialorder %v337_v19, 0.7853982  ;;  %v542_v7 = vshrl.u32 %v3087_v21, 16 }
  0x77   :  { %v331_v57 = vsel %vm329_vm12, %v3089_v33, %v330_v38  ;;  %v1332_v46 = vshrl.u32 %v1331_v52, 23  ;;  %v461_v8 = vsub.s32 4, %v3067_v25  ;;  %v535_v13 = vsel %vm525_vm3, %v532_v54, %v534_v48 }
  0x78   :  { %v335_v44 = vsel %vm328_vm13, %v331_v57, %v334_v40  ;;  %v2600_v39 = vadd.s32 4294967294, %v443_v47  ;;  %v536_v19 = vsel %vm524_vm15, %v3091_v41, %v517_v27  ;;  %v431_v11 = vadd.s32 %v3024_v12, %v3022_v14 }
  0x79   :  { %v3136_v10 = vsel %vm325_vm14, nan, %v335_v44  ;;  %v537_v61 = vsel %vm527_vm2, %v523_v16, 1326507024  ;;  %v3151_v24 = vand.u32 8388607, %v3772_v26  ;;  %v565_v37 = vand.u32 65535, %v535_v13 }
  0x7a   :  { %1264 = vst [vmem:[#allocation5 + $0x8] sm:$0xff] %v3136_v10  ;;  %vm2601_vm6 = vcmp.lt.s32.totalorder %v2600_v39, 0  ;;  %v538_v29 = vsel %vm526_vm1, %v520_v56, %v537_v61  ;;  %v566_v31 = vshrl.u32 %v535_v13, 16  ;;  %v462_v12 = vsel %vm339_vm4, %v461_v8, %v3067_v25 }
  0x7b   :  { %v446_v6 = vsel %vm2601_vm6, 0, %v2600_v39  ;;  %v539_v14 = vsel %vm525_vm3, %v536_v19, %v538_v29  ;;  %v508_v40 = vshrl.u32 %v2708_v28, %v3062_v23  ;;  %v2617_v16 = vadd.s32 4294967169, %v1332_v46 }
  0x7c   :  { %v447_v49 = vsub.s32 32, %v446_v6  ;;  %v448_v3 = vshll.u32 %v439_v20, %v446_v6  ;;  %v451_v52 = vsub.s32 4294967266, %v446_v6  ;;  %v543_v53 = vand.u32 65535, %v539_v14 }
  0x7d   :  { %v529_v56 = vsel %vm527_vm2, %v517_v27, 2102212464  ;;  %v544_v43 = vshrl.u32 %v539_v14, 16  ;;  %v567_v57 = vmul.u32 %v565_v37, %v541_v59  ;;  %v568_v48 = vmul.u32 %v566_v31, %v541_v59 }
  0x7e   :  { %v449_v47 = vshrl.u32 %v431_v11, %v447_v49  ;;  %v452_v54 = vadd.s32 127, %v451_v52  ;;  %v547_v20 = vmul.u32 %v543_v53, %v542_v7  ;;  %v569_v44 = vmul.u32 %v565_v37, %v542_v7 }
  0x7f   :  { %v545_v19 = vmul.u32 %v543_v53, %v541_v59  ;;  %v546_v61 = vmul.u32 %v544_v43, %v541_v59  ;;  %v3166_v25 = vsel %vm3129_vm5, 0, %v462_v12  ;;  %v548_v23 = vmul.u32 %v544_v43, %v542_v7 }
  0x80   :  { %v450_v39 = vor.u32 %v449_v47, %v448_v3  ;;  %v453_v13 = vshll.u32 %v452_v54, 23  ;;  %v570_v46 = vmul.u32 %v566_v31, %v542_v7  ;;  %v571_v8 = vshll.u32 %v568_v48, 16 }
  0x81   :  { %v549_v29 = vshll.u32 %v546_v61, 16  ;;  %v551_v27 = vshll.u32 %v547_v20, 16  ;;  %v528_v49 = vsel %vm524_vm15, %v508_v40, %v3082_v62  ;;  %v530_v37 = vsel %vm526_vm1, %v3091_v41, %v529_v56 }
  0x82   :  { %v454_v11 = vor.u32 4788187, %v453_v13  ;;  %v457_v6 = vcvt.s32.f32 %v450_v39  ;;  %v573_v59 = vshll.u32 %v569_v44, 16  ;;  %vm575_vm7 = vc.u32 %v567_v57, %v571_v8 }
  0x83   :  { %vm553_vm9 = vc.u32 %v545_v19, %v549_v29  ;;  %v555_v52 = vadd.s32 %v549_v29, %v545_v19  ;;  %v576_v7 = vsel %vm575_vm7, 1, %v2714_v51  ;;  %v550_v31 = vshrl.u32 %v546_v61, 16 }
  0x84   :  { %v455_v3 = vand.u32 2147483647, %v454_v11  ;;  %v554_v14 = vsel %vm553_vm9, 1, %v2714_v51  ;;  %v577_v12 = vadd.s32 %v571_v8, %v567_v57  ;;  %v578_v53 = vadd.s32 %v576_v7, %v570_v46 }
  0x85   :  { %v556_v54 = vadd.s32 %v554_v14, %v548_v23  ;;  %vm557_vm10 = vc.u32 %v555_v52, %v551_v27  ;;  %v1338_v62 = vadd.s32 1, %v2617_v16  ;;  %v552_v40 = vshrl.u32 %v547_v20, 16 }
  0x86   :  { %v458_v47 = vmul.f32 %v457_v6, %v455_v3  ;;  %v558_v43 = vsel %vm557_vm10, 1, %v2714_v51  ;;  %v572_v41 = vshrl.u32 %v568_v48, 16  ;;  %vm579_vm11 = vc.u32 %v577_v12, %v573_v59  ;;  %v3184_v48 = vld [vmem:[#allocation2 + $0x10] sm:$0xff] }
  0x87   :  { %v560_v39 = vadd.s32 %v558_v43, %v556_v54  ;;  %v580_v13 = vsel %vm579_vm11, 1, %v2714_v51  ;;  %vm1339_vm12 = vcmp.gt.s32.totalorder %v1338_v62, 0  ;;  %v531_v19 = vsel %vm525_vm3, %v528_v49, %v530_v37 }
  0x88   :  { %v459_v56 = vxor.u32 2147483648, %v458_v47  ;;  %v574_v61 = vshrl.u32 %v569_v44, 16  ;;  %v582_v57 = vadd.s32 %v580_v13, %v578_v53  ;;  %v1340_v46 = vsel %vm1339_vm12, %v1338_v62, 0 }
  0x89   :  { %v561_v16 = vadd.s32 %v560_v39, %v550_v31  ;;  %v3182_v20 = vadd.s32 %v577_v12, %v573_v59  ;;  %v1342_v8 = vand.u32 31, %v1340_v46  ;;  %v481_v27 = vadd.s32 3, %v3166_v25 }
  0x8a   :  { %v460_v23 = vsel %vm339_vm4, %v459_v56, %v458_v47  ;;  %v583_v6 = vadd.s32 %v582_v57, %v572_v41  ;;  %v585_v49 = vmul.u32 %v3087_v21, %v531_v19  ;;  %v1336_v37 = vor.u32 8388608, %v3151_v24 }
  0x8b   :  { %v463_v11 = vsel %vm3129_vm5, %v3184_v48, %v460_v23  ;;  %v3189_v58 = vadd.s32 %v561_v16, %v552_v40  ;;  %v3191_v44 = vsub.s32 32, %v1342_v8  ;;  %v1348_v60 = vshll.u32 %v2709_v30, %v1342_v8 }
  0x8c   :  { %v465_v29 = vmul.f32 %v463_v11, %v463_v11  ;;  %v584_v2 = vadd.s32 %v583_v6, %v574_v61  ;;  %v1351_v31 = vshll.u32 %v3779_v32, %v1342_v8  ;;  %v1354_v14 = vshll.u32 %v3777_v34, %v1342_v8 }
  0x8d   :  { %vm587_vm13 = vc.u32 %v3189_v58, %v3182_v20  ;;  %v1349_v7 = vshrl.u32 %v3779_v32, %v3191_v44  ;;  %v1352_v21 = vshrl.u32 %v3777_v34, %v3191_v44  ;;  %v1355_v24 = vshrl.u32 %v3775_v36, %v3191_v44 }
  0x8e   :  { %v466_v59 = vmul.f32 -0.001358992, %v465_v29  ;;  %v473_v3 = vmul.f32 -0.00019511016, %v465_v29  ;;  %v588_v52 = vadd.s32 1, %v584_v2  ;;  %v482_v47 = vand.u32 3, %v481_v27 }
  0x8f   :  { %v3207_v62 = vshrl.u32 %v1340_v46, 5  ;;  %v1357_v40 = vshll.u32 %v3775_v36, %v1342_v8  ;;  %v1345_v39 = vshll.u32 %v2708_v28, %v1342_v8  ;;  %v1346_v13 = vshrl.u32 %v2709_v30, %v3191_v44 }
  0x90   :  { %v467_v12 = vadd.f32 0.041655596, %v466_v59  ;;  %v474_v53 = vadd.f32 0.008332121, %v473_v3  ;;  %v589_v54 = vsel %vm587_vm13, %v588_v52, %v584_v2  ;;  %v3213_v19 = vor.u32 %v1349_v7, %v1348_v60 }
  0x91   :  { %v590_v56 = vadd.s32 %v589_v54, %v585_v49  ;;  %v1356_v61 = vor.u32 %v1355_v24, %v1354_v14  ;;  %v1358_v57 = vshrl.u32 %v3773_v45, %v3191_v44  ;;  %v1353_v6 = vor.u32 %v1352_v21, %v1351_v31 }
  0x92   :  { %v468_v43 = vmul.f32 %v467_v12, %v465_v29  ;;  %v475_v41 = vmul.f32 %v474_v53, %v465_v29  ;;  %vm1360_vm15 = vcmp.lt.s32.totalorder %v3207_v62, 1  ;;  %vm1363_vm0 = vcmp.lt.s32.totalorder %v3207_v62, 4 }
  0x93   :  { %v591_v46 = vadd.s32 536870912, %v590_v56  ;;  %v1359_v27 = vor.u32 %v1358_v57, %v1357_v40  ;;  %v3219_v2 = vshll.u32 %v1336_v37, 8  ;;  %vm1362_vm1 = vcmp.lt.s32.totalorder %v3207_v62, 3 }
  0x94   :  { %v469_v23 = vadd.f32 -0.4999988, %v468_v43  ;;  %v476_v16 = vadd.f32 -0.16666654, %v475_v41  ;;  %v3222_v3 = vor.u32 %v1346_v13, %v1345_v39  ;;  %vm1361_vm2 = vcmp.lt.s32.totalorder %v3207_v62, 2 }
  0x95   :  { %v592_v59 = vshrl.u32 %v591_v46, 30  ;;  %v1369_v60 = vsel %vm1363_vm0, %v1356_v61, 920167782  ;;  %v1373_v52 = vsel %vm1363_vm0, %v1359_v27, 1326507024  ;;  %vm483_vm3 = vcmp.lt.s32.totalorder %v482_v47, 2 }
  0x96   :  { %v470_v8 = vmul.f32 %v469_v23, %v465_v29  ;;  %v477_v49 = vmul.f32 %v476_v16, %v465_v29  ;;  %v1372_v29 = vsel %vm1360_vm15, %v3213_v19, %v1353_v6  ;;  %vm484_vm4 = vcmp.eq.s32.totalorder %v482_v47, 0  ;;  %v2653_v46 = vld [vmem:[#allocation2 + $0x8] sm:$0xff] }
  0x97   :  { %v593_v37 = vshll.u32 %v592_v59, 30  ;;  %vm487_vm5 = vcmp.eq.s32.totalorder %v482_v47, 2  ;;  %v1374_v14 = vsel %vm1362_vm1, %v1356_v61, %v1373_v52  ;;  %v1377_v24 = vand.u32 65535, %v3219_v2 }
  0x98   :  { %v3229_v7 = vadd.f32 1.0, %v470_v8  ;;  %v478_v31 = vadd.f32 1.0, %v477_v49  ;;  %v616_v54 = vsub.s32 4, %v592_v59  ;;  %v1368_v40 = vsel %vm1360_vm15, %v3222_v3, %v3213_v19 }
  0x99   :  { %v594_v21 = vsub.s32 %v590_v56, %v593_v37  ;;  %v1370_v43 = vsel %vm1362_vm1, %v1353_v6, %v1369_v60  ;;  %v1375_v41 = vsel %vm1361_vm2, %v1372_v29, %v1374_v14  ;;  %vm480_vm7 = vweird.f32 %v3184_v48 }
  0x9a   :  { %v3236_v12 = vmul.f32 %v478_v31, %v463_v11  ;;  %v488_v53 = vxor.u32 2147483648, %v3229_v7  ;;  %vm494_vm9 = vcmp.lt.s32.totalorder %v3008_v35, 0  ;;  %v1379_v13 = vand.u32 65535, %v1375_v41 }
  0x9b   :  { %vm595_vm6 = vcmp.lt.s32.totalorder %v594_v21, 0  ;;  %v596_v39 = vsub.s32 0, %v594_v21  ;;  %v1380_v61 = vshrl.u32 %v1375_v41, 16  ;;  %v3259_v16 = vshrl.u32 %v3219_v2, 16 }
  0x9c   :  { %v485_v11 = vxor.u32 2147483648, %v3236_v12  ;;  %v489_v56 = vsel %vm487_vm5, %v488_v53, %v3236_v12  ;;  %v3261_v27 = vmul.f32 8.0, %v2653_v46  ;;  %v3266_v60 = vsel %vm1361_vm2, %v1368_v40, %v1370_v43 }
  0x9d   :  { %v597_v23 = vsel %vm595_vm6, %v596_v39, %v594_v21  ;;  %v3268_v52 = vmul.u32 %v1380_v61, %v1377_v24  ;;  %v617_v37 = vsel %vm494_vm9, %v616_v54, %v592_v59  ;;  %v1401_v29 = vand.u32 65535, %v3266_v60 }
  0x9e   :  { %v486_v57 = vsel %vm484_vm4, %v3229_v7, %v485_v11  ;;  %v598_v49 = vclz %v597_v23  ;;  %vm3280_vm10 = vcmp.le.f32.partialorder %v492_v15, 0.7853982  ;;  %v1381_v40 = vmul.u32 %v1379_v13, %v1377_v24 }
  0x9f   :  { %v490_v8 = vsel %vm483_vm3, %v486_v57, %v489_v56  ;;  %v1385_v43 = vshll.u32 %v3268_v52, 16  ;;  %v586_v41 = vadd.s32 %v3182_v20, %v3189_v58  ;;  %v3289_v59 = vshrl.u32 %v2708_v28, %v3191_v44 }
  0xa0   :  { %v3272_v31 = vsel %vm480_vm7, nan, %v490_v8  ;;  %v2603_v14 = vadd.s32 4294967294, %v598_v49  ;;  %v3292_v54 = vmul.u32 %v1379_v13, %v3259_v16  ;;  %v1402_v56 = vshrl.u32 %v3266_v60, 16 }
  0xa1   :  { %1265 = vst [vmem:[#allocation5 + $0x10] sm:$0xff] %v3272_v31  ;;  %v3297_v15 = vsel %vm3280_vm10, 0, %v617_v37  ;;  %v3301_v39 = vsel %vm1363_vm0, %v1353_v6, 2102212464  ;;  %v1486_v20 = vand.u32 2139095040, %v3261_v27  ;;  %v1384_v44 = vmul.u32 %v1380_v61, %v3259_v16 }
  0xa2   :  { %vm2604_vm11 = vcmp.lt.s32.totalorder %v2603_v14, 0  ;;  %v1386_v57 = vshrl.u32 %v3268_v52, 16  ;;  %v3308_v13 = vmul.u32 %v1401_v29, %v1377_v24  ;;  %vm1389_vm12 = vc.u32 %v1381_v40, %v1385_v43 }
  0xa3   :  { %v601_v58 = vsel %vm2604_vm11, 0, %v2603_v14  ;;  %v3311_v49 = vadd.s32 3, %v3297_v15  ;;  %v791_v6 = vand.u32 3, %v2927_v18  ;;  %v1387_v37 = vshll.u32 %v3292_v54, 16 }
  0xa4   :  { %v602_v23 = vsub.s32 32, %v601_v58  ;;  %v603_v46 = vshll.u32 %v594_v21, %v601_v58  ;;  %v606_v8 = vsub.s32 4294967266, %v601_v58  ;;  %v3317_v61 = vmul.u32 %v1402_v56, %v1377_v24 }
  0xa5   :  { %v945_v45 = vand.u32 3, %v3005_v55  ;;  %v1391_v36 = vadd.s32 %v1385_v43, %v1381_v40  ;;  %vm793_vm13 = vcmp.eq.s32.totalorder %v791_v6, 0  ;;  %vm796_vm0 = vcmp.eq.s32.totalorder %v791_v6, 2 }
  0xa6   :  { %v604_v14 = vshrl.u32 %v586_v41, %v602_v23  ;;  %v607_v26 = vadd.s32 127, %v606_v8  ;;  %v1099_v21 = vand.u32 3, %v3166_v25  ;;  %v1390_v58 = vsel %vm1389_vm12, 1, %v2714_v51 }
  0xa7   :  { %vm792_vm3 = vcmp.lt.s32.totalorder %v791_v6, 2  ;;  %v795_v18 = vsel %vm793_vm13, %v3011_v63, %v175_v22  ;;  %v798_v24 = vsel %vm796_vm0, %v178_v50, %v3018_v17  ;;  %v1272_v55 = vmul.f32 2.0, %v3051_v4 }
  0xa8   :  { %v605_v34 = vor.u32 %v604_v14, %v603_v46  ;;  %v608_v32 = vshll.u32 %v607_v26, 23  ;;  %vm946_vm4 = vcmp.lt.s32.totalorder %v945_v45, 2  ;;  %vm947_vm5 = vcmp.eq.s32.totalorder %v945_v45, 0 }
  0xa9   :  { %v799_v25 = vsel %vm792_vm3, %v795_v18, %v798_v24  ;;  %v949_v26 = vsel %vm947_vm5, %v3089_v33, %v330_v38  ;;  %vm950_vm6 = vcmp.eq.s32.totalorder %v945_v45, 2  ;;  %v1273_v22 = vmul.f32 2.0, %v3136_v10 }
  0xaa   :  { %v609_v40 = vor.u32 4788187, %v608_v32  ;;  %v612_v43 = vcvt.s32.f32 %v605_v34  ;;  %v800_v41 = vsel %vm170_vm8, nan, %v799_v25  ;;  %vm1100_vm11 = vcmp.lt.s32.totalorder %v1099_v21, 2 }
  0xab   :  { %1268 = vst [vmem:[#allocation5 + $0x20] sm:$0xff] %v800_v41  ;;  %v1276_v17 = vmul.f32 %v1272_v55, %v800_v41  ;;  %v952_v32 = vsel %vm950_vm6, %v333_v42, %v3096_v9  ;;  %vm1101_vm12 = vcmp.eq.s32.totalorder %v1099_v21, 0  ;;  %vm1104_vm13 = vcmp.eq.s32.totalorder %v1099_v21, 2 }
  0xac   :  { %v610_v63 = vand.u32 2147483647, %v609_v40  ;;  %v953_v34 = vsel %vm946_vm4, %v949_v26, %v952_v32  ;;  %v1103_v50 = vsel %vm1101_vm12, %v3229_v7, %v485_v11  ;;  %v1274_v0 = vmul.f32 2.0, %v3272_v31 }
  0xad   :  { %1289 = vst [vmem:[#allocation5 + $0x40] sm:$0xff] %v1276_v17  ;;  %v954_v38 = vsel %vm325_vm14, nan, %v953_v34  ;;  %v1106_v23 = vsel %vm1104_vm13, %v488_v53, %v3236_v12  ;;  %v3350_v33 = vmul.u32 %v1401_v29, %v3259_v16  ;;  %v1392_v11 = vadd.s32 %v1390_v58, %v1384_v44 }
  0xae   :  { %v613_v45 = vmul.f32 %v612_v43, %v610_v63  ;;  %1269 = vst [vmem:[#allocation5 + $0x28] sm:$0xff] %v954_v38  ;;  %v1277_v9 = vmul.f32 %v1273_v22, %v954_v38  ;;  %v1107_v42 = vsel %vm1100_vm11, %v1103_v50, %v1106_v23  ;;  %vm1393_vm8 = vc.u32 %v1391_v36, %v1387_v37 }
  0xaf   :  { %v1108_v1 = vsel %vm480_vm7, nan, %v1107_v42  ;;  %v1280_v8 = vmul.f32 %v1272_v55, %v3051_v4  ;;  %v1281_v7 = vmul.f32 %v1273_v22, %v3136_v10  ;;  %v1282_v53 = vmul.f32 %v1274_v0, %v3272_v31 }
  0xb0   :  { %v614_v46 = vxor.u32 2147483648, %v613_v45  ;;  %1290 = vst [vmem:[#allocation5 + $0x48] sm:$0xff] %v1277_v9  ;;  %v1278_v12 = vmul.f32 %v1274_v0, %v1108_v1  ;;  %v1298_v29 = vmul.f32 2.0, %v1276_v17  ;;  %v1299_v6 = vmul.f32 2.0, %v1277_v9 }
  0xb1   :  { %1270 = vst [vmem:[#allocation5 + $0x30] sm:$0xff] %v1108_v1  ;;  %v1284_v44 = vsub.f32 1.0, %v1280_v8  ;;  %v1285_v36 = vsub.f32 1.0, %v1281_v7  ;;  %v1394_v37 = vsel %vm1393_vm8, 1, %v2714_v51  ;;  %v1286_v10 = vsub.f32 1.0, %v1282_v53 }
  0xb2   :  { %v615_v14 = vsel %vm494_vm9, %v614_v46, %v613_v45  ;;  %1291 = vst [vmem:[#allocation5 + $0x50] sm:$0xff] %v1278_v12  ;;  %v1300_v21 = vmul.f32 2.0, %v1278_v12  ;;  %v1306_v58 = vmul.f32 %v1298_v29, %v1276_v17  ;;  %v1307_v55 = vmul.f32 %v1299_v6, %v1277_v9 }
  0xb3   :  { %v3364_v4 = vsel %vm3280_vm10, %v3008_v35, %v615_v14  ;;  %1294 = vst [vmem:[#allocation5 + $0x60] sm:$0xff] %v1284_v44  ;;  %v1302_v18 = vmul.f32 %v1298_v29, %v1284_v44  ;;  %v1303_v24 = vmul.f32 %v1299_v6, %v1285_v36  ;;  %v1388_v25 = vshrl.u32 %v3292_v54, 16 }
  0xb4   :  { %v620_v31 = vmul.f32 %v3364_v4, %v3364_v4  ;;  %1295 = vst [vmem:[#allocation5 + $0x68] sm:$0xff] %v1285_v36  ;;  %v1304_v40 = vmul.f32 %v1300_v21, %v1286_v10  ;;  %v1308_v43 = vmul.f32 %v1300_v21, %v1278_v12  ;;  %v1396_v26 = vadd.s32 %v1394_v37, %v1392_v11 }
  0xb5   :  { %1296 = vst [vmem:[#allocation5 + $0x70] sm:$0xff] %v1286_v10  ;;  %v1310_v22 = vsub.f32 1.0, %v1306_v58  ;;  %v1364_v63 = vsel %vm1360_vm15, %v3289_v59, %v3222_v3  ;;  %v1311_v17 = vsub.f32 1.0, %v1307_v55  ;;  %v1406_v34 = vmul.u32 %v1402_v56, %v3259_v16 }
  0xb6   :  { %v621_v47 = vmul.f32 -0.001358992, %v620_v31  ;;  %v628_v41 = vmul.f32 -0.00019511016, %v620_v31  ;;  %1315 = vst [vmem:[#allocation5 + $0x80] sm:$0xff] %v1302_v18  ;;  %v1312_v32 = vsub.f32 1.0, %v1308_v43  ;;  %v1366_v45 = vsel %vm1362_vm1, %v3213_v19, %v3301_v39 }
  0xb7   :  { %v1407_v50 = vshll.u32 %v3317_v61, 16  ;;  %1316 = vst [vmem:[#allocation5 + $0x88] sm:$0xff] %v1303_v24  ;;  %v1409_v38 = vshll.u32 %v3350_v33, 16  ;;  %v637_v3 = vand.u32 3, %v3311_v49  ;;  %v1397_v59 = vadd.s32 %v1396_v26, %v1386_v57 }
  0xb8   :  { %v622_v54 = vadd.f32 0.041655596, %v621_v47  ;;  %v629_v0 = vadd.f32 0.008332121, %v628_v41  ;;  %1317 = vst [vmem:[#allocation5 + $0x90] sm:$0xff] %v1304_v40  ;;  %v1487_v19 = vshrl.u32 %v1486_v20, 23  ;;  %vm635_vm5 = vweird.f32 %v3008_v35 }
  0xb9   :  { %vm1411_vm14 = vc.u32 %v3308_v13, %v1407_v50  ;;  %v1413_v16 = vadd.s32 %v1407_v50, %v3308_v13  ;;  %1320 = vst [vmem:[#allocation5 + $0xa0] sm:$0xff] %v1310_v22  ;;  %v1253_v39 = vand.u32 3, %v3297_v15  ;;  %v1408_v49 = vshrl.u32 %v3317_v61, 16 }
  0xba   :  { %v623_v60 = vmul.f32 %v622_v54, %v620_v31  ;;  %v630_v56 = vmul.f32 %v629_v0, %v620_v31  ;;  %v1412_v23 = vsel %vm1411_vm14, 1, %v2714_v51  ;;  %1321 = vst [vmem:[#allocation5 + $0xa8] sm:$0xff] %v1311_v17  ;;  %v1367_v13 = vsel %vm1361_vm2, %v1364_v63, %v1366_v45 }
  0xbb   :  { %v1414_v9 = vadd.s32 %v1412_v23, %v1406_v34  ;;  %vm1415_vm15 = vc.u32 %v1413_v16, %v1409_v38  ;;  %1322 = vst [vmem:[#allocation5 + $0xb0] sm:$0xff] %v1312_v32  ;;  %v1410_v11 = vshrl.u32 %v3350_v33, 16  ;;  %v1483_v20 = vand.u32 2147483647, %v3261_v27 }
  0xbc   :  { %v624_v52 = vadd.f32 -0.4999988, %v623_v60  ;;  %v631_v57 = vadd.f32 -0.16666654, %v630_v56  ;;  %v1416_v42 = vsel %vm1415_vm15, 1, %v2714_v51  ;;  %v2620_v1 = vadd.s32 4294967169, %v1487_v19 }
  0xbd   :  { %v1418_v46 = vadd.s32 %v1416_v42, %v1414_v9  ;;  %v3397_v7 = vadd.s32 %v1397_v59, %v1388_v25  ;;  %v3399_v61 = vadd.s32 %v1413_v16, %v1409_v38  ;;  %vm638_vm1 = vcmp.lt.s32.totalorder %v637_v3, 2 }
  0xbe   :  { %v625_v15 = vmul.f32 %v624_v52, %v620_v31  ;;  %v632_v8 = vmul.f32 %v631_v57, %v620_v31  ;;  %v1493_v53 = vadd.s32 1, %v2620_v1  ;;  %vm642_vm2 = vcmp.eq.s32.totalorder %v637_v3, 2 }
  0xbf   :  { %v1419_v12 = vadd.s32 %v1418_v46, %v1408_v49  ;;  %vm1258_vm7 = vcmp.eq.s32.totalorder %v1253_v39, 2  ;;  %v1421_v33 = vmul.u32 %v3219_v2, %v1367_v13  ;;  %v1490_v14 = vand.u32 8388607, %v1483_v20 }
  0xc0   :  { %v626_v29 = vadd.f32 1.0, %v625_v15  ;;  %v633_v62 = vadd.f32 1.0, %v632_v8  ;;  %vm1494_vm9 = vcmp.gt.s32.totalorder %v1493_v53, 0  ;;  %vm1423_vm10 = vc.u32 %v3397_v7, %v3399_v61 }
  0xc1   :  { %v1420_v6 = vadd.s32 %v1419_v12, %v1410_v11  ;;  %v1495_v37 = vsel %vm1494_vm9, %v1493_v53, 0  ;;  %vm639_vm0 = vcmp.eq.s32.totalorder %v637_v3, 0  ;;  %vm1255_vm3 = vcmp.eq.s32.totalorder %v1253_v39, 0 }
  0xc2   :  { %v634_v44 = vmul.f32 %v633_v62, %v3364_v4  ;;  %v643_v36 = vxor.u32 2147483648, %v626_v29  ;;  %v1497_v21 = vand.u32 31, %v1495_v37  ;;  %vm1254_vm4 = vcmp.lt.s32.totalorder %v1253_v39, 2 }
  0xc3   :  { %v1424_v10 = vadd.s32 1, %v1420_v6  ;;  %v1491_v43 = vor.u32 8388608, %v1490_v14  ;;  %v3416_v34 = vshrl.u32 %v1495_v37, 5  ;;  %v3789_v50 = vmov 2131351028  }
  0xc4   :  { %v640_v58 = vxor.u32 2147483648, %v634_v44  ;;  %v644_v31 = vsel %vm642_vm2, %v643_v36, %v634_v44  ;;  %v1260_v2 = vsel %vm1258_vm7, %v643_v36, %v634_v44  ;;  %v3409_v24 = vsub.s32 32, %v1497_v21 }
  0xc5   :  { %v1425_v18 = vsel %vm1423_vm10, %v1424_v10, %v1420_v6  ;;  %v1500_v47 = vshll.u32 %v2708_v28, %v1497_v21  ;;  %v1503_v41 = vshll.u32 %v2709_v30, %v1497_v21  ;;  %v1506_v0 = vshll.u32 %v3789_v50, %v1497_v21 }
  0xc6   :  { %v641_v4 = vsel %vm639_vm0, %v626_v29, %v640_v58  ;;  %v1257_v55 = vsel %vm1255_vm3, %v626_v29, %v640_v58  ;;  %v1426_v40 = vadd.s32 %v1425_v18, %v1421_v33  ;;  %v1501_v35 = vshrl.u32 %v2709_v30, %v3409_v24 }
  0xc7   :  { %v645_v25 = vsel %vm638_vm1, %v641_v4, %v644_v31  ;;  %v1261_v26 = vsel %vm1254_vm4, %v1257_v55, %v1260_v2  ;;  %v1504_v54 = vshrl.u32 %v3789_v50, %v3409_v24  ;;  %v3790_v38 = vmov 2102212464  }
  0xc8   :  { %v646_v22 = vsel %vm635_vm5, nan, %v645_v25  ;;  %v1262_v63 = vsel %vm635_vm5, nan, %v1261_v26  ;;  %v1427_v17 = vadd.s32 536870912, %v1426_v40  ;;  %v1507_v3 = vshrl.u32 %v3790_v38, %v3409_v24 }
  0xc9   :  { %1266 = vst [vmem:[#allocation5 + $0x18] sm:$0xff] %v646_v22  ;;  %v1275_v32 = vmul.f32 2.0, %v646_v22  ;;  %v1509_v59 = vshll.u32 %v3790_v38, %v1497_v21  ;;  %v3791_v16 = vmov 920167782   ;;  %v3429_v19 = vmul.f32 8.0, %v3184_v48 }
  0xca   :  { %1271 = vst [vmem:[#allocation5 + $0x38] sm:$0xff] %v1262_v63  ;;  %v3421_v45 = vshrl.u32 %v1427_v17, 30  ;;  %v1510_v60 = vshrl.u32 %v3791_v16, %v3409_v24  ;;  %v1502_v49 = vor.u32 %v1501_v35, %v1500_v47  ;;  %v1505_v9 = vor.u32 %v1504_v54, %v1503_v41 }
  0xcb   :  { %v1279_v56 = vmul.f32 %v1275_v32, %v1262_v63  ;;  %v1283_v23 = vmul.f32 %v1275_v32, %v646_v22  ;;  %v1512_v52 = vshll.u32 %v3791_v16, %v1497_v21  ;;  %v3792_v11 = vmov 1326507024  }
  0xcc   :  { %v1429_v39 = vshll.u32 %v3421_v45, 30  ;;  %v1511_v42 = vor.u32 %v1510_v60, %v1509_v59  ;;  %v1513_v46 = vshrl.u32 %v3792_v11, %v3409_v24  ;;  %v1508_v15 = vor.u32 %v1507_v3, %v1506_v0 }
  0xcd   :  { %1292 = vst [vmem:[#allocation5 + $0x58] sm:$0xff] %v1279_v56  ;;  %v1287_v57 = vsub.f32 1.0, %v1283_v23  ;;  %v1301_v13 = vmul.f32 2.0, %v1279_v56  ;;  %vm1515_vm6 = vcmp.lt.s32.totalorder %v3416_v34, 1  ;;  %v3438_v48 = vshll.u32 %v1491_v43, 8 }
  0xce   :  { %v3435_v1 = vsub.s32 %v1426_v40, %v1429_v39  ;;  %v1514_v53 = vor.u32 %v1513_v46, %v1512_v52  ;;  %vm1517_vm11 = vcmp.lt.s32.totalorder %v3416_v34, 3  ;;  %vm1516_vm13 = vcmp.lt.s32.totalorder %v3416_v34, 2 }
  0xcf   :  { %1297 = vst [vmem:[#allocation5 + $0x78] sm:$0xff] %v1287_v57  ;;  %v1305_v8 = vmul.f32 %v1301_v13, %v1287_v57  ;;  %v1309_v12 = vmul.f32 %v1301_v13, %v1279_v56  ;;  %vm1518_vm8 = vcmp.lt.s32.totalorder %v3416_v34, 4  ;;  %v1523_v6 = vsel %vm1515_vm6, %v1502_v49, %v1505_v9 }
  0xd0   :  { %vm1431_vm12 = vcmp.lt.s32.totalorder %v3435_v1, 0  ;;  %v1432_v29 = vsub.s32 0, %v3435_v1  ;;  %v1524_v33 = vsel %vm1518_vm8, %v1511_v42, 920167782  ;;  %vm1330_vm14 = vcmp.lt.s32.totalorder %v3080_v5, 0 }
  0xd1   :  { %1318 = vst [vmem:[#allocation5 + $0x98] sm:$0xff] %v1305_v8  ;;  %v1313_v62 = vsub.f32 1.0, %v1309_v12  ;;  %v1525_v44 = vsel %vm1517_vm11, %v1508_v15, %v1524_v33  ;;  %v1527_v36 = vsel %vm1515_vm6, %v1505_v9, %v1508_v15  ;;  %v1528_v21 = vsel %vm1518_vm8, %v1514_v53, 1326507024 }
  0xd2   :  { %v1433_v14 = vsel %vm1431_vm12, %v1432_v29, %v3435_v1  ;;  %v1526_v10 = vsel %vm1516_vm13, %v1523_v6, %v1525_v44  ;;  %v1641_v58 = vand.u32 2139095040, %v3429_v19  ;;  %v1422_v31 = vadd.s32 %v3399_v61, %v3397_v7 }
  0xd3   :  { %1323 = vst [vmem:[#allocation5 + $0xb8] sm:$0xff] %v1313_v62  ;;  %v1434_v37 = vclz %v1433_v14  ;;  %v1529_v2 = vsel %vm1517_vm11, %v1511_v42, %v1528_v21  ;;  %v1532_v18 = vand.u32 65535, %v3438_v48  ;;  %v1557_v4 = vshrl.u32 %v1526_v10, 16 }
  0xd4   :  { %v1499_v40 = vshrl.u32 %v2708_v28, %v3409_v24  ;;  %v1530_v43 = vsel %vm1516_vm13, %v1527_v36, %v1529_v2  ;;  %v1533_v25 = vshrl.u32 %v3438_v48, 16  ;;  %v1452_v26 = vsub.s32 4, %v3421_v45 }
  0xd5   :  { %v2618_v55 = vadd.s32 4294967294, %v1434_v37  ;;  %v1534_v47 = vand.u32 65535, %v1530_v43  ;;  %v1535_v41 = vshrl.u32 %v1530_v43, 16  ;;  %v1556_v7 = vand.u32 65535, %v1526_v10 }
  0xd6   :  { %v1520_v61 = vsel %vm1518_vm8, %v1508_v15, 2102212464  ;;  %v1638_v22 = vand.u32 2147483647, %v3429_v19  ;;  %v1642_v63 = vshrl.u32 %v1641_v58, 23  ;;  %v1559_v32 = vmul.u32 %v1557_v4, %v1532_v18 }
  0xd7   :  { %vm2619_vm15 = vcmp.lt.s32.totalorder %v2618_v55, 0  ;;  %v1536_v35 = vmul.u32 %v1534_v47, %v1532_v18  ;;  %v1537_v24 = vmul.u32 %v1535_v41, %v1532_v18  ;;  %v3793_v54 = vand.u32 2147483647, %v3080_v5 }
  0xd8   :  { %v1437_v17 = vsel %vm2619_vm15, 0, %v2618_v55  ;;  %v1538_v56 = vmul.u32 %v1534_v47, %v1533_v25  ;;  %v1453_v23 = vsel %vm1330_vm14, %v1452_v26, %v3421_v45  ;;  %v1519_v39 = vsel %vm1515_vm6, %v1499_v40, %v1502_v49 }
  0xd9   :  { %vm3476_vm1 = vcmp.le.f32.partialorder %v3793_v54, 0.7853982  ;;  %v1438_v3 = vsub.s32 32, %v1437_v17  ;;  %v1439_v59 = vshll.u32 %v3435_v1, %v1437_v17  ;;  %v1442_v60 = vsub.s32 4294967266, %v1437_v17 }
  0xda   :  { %v1521_v52 = vsel %vm1517_vm11, %v1505_v9, %v1520_v61  ;;  %v1560_v57 = vmul.u32 %v1556_v7, %v1533_v25  ;;  %v1539_v46 = vmul.u32 %v1535_v41, %v1533_v25  ;;  %v1540_v15 = vshll.u32 %v1537_v24, 16 }
  0xdb   :  { %v1440_v13 = vshrl.u32 %v1422_v31, %v1438_v3  ;;  %v1443_v42 = vadd.s32 127, %v1442_v60  ;;  %v1542_v8 = vshll.u32 %v1538_v56, 16  ;;  %v1558_v12 = vmul.u32 %v1556_v7, %v1532_v18 }
  0xdc   :  { %v1562_v1 = vshll.u32 %v1559_v32, 16  ;;  %v2623_v53 = vadd.s32 4294967169, %v1642_v63  ;;  %vm1544_vm2 = vc.u32 %v1536_v35, %v1540_v15  ;;  %v1546_v6 = vadd.s32 %v1540_v15, %v1536_v35 }
  0xdd   :  { %v1441_v29 = vor.u32 %v1440_v13, %v1439_v59  ;;  %v1444_v62 = vshll.u32 %v1443_v42, 23  ;;  %v1541_v45 = vshrl.u32 %v1537_v24, 16  ;;  %v1545_v33 = vsel %vm1544_vm2, 1, %v2714_v51 }
  0xde   :  { %v1561_v49 = vmul.u32 %v1557_v4, %v1533_v25  ;;  %v1564_v14 = vshll.u32 %v1560_v57, 16  ;;  %v1547_v36 = vadd.s32 %v1545_v33, %v1539_v46  ;;  %vm1548_vm7 = vc.u32 %v1546_v6, %v1542_v8 }
  0xdf   :  { %v1445_v44 = vor.u32 4788187, %v1444_v62  ;;  %v1448_v9 = vcvt.s32.f32 %v1441_v29  ;;  %v1543_v37 = vshrl.u32 %v1538_v56, 16  ;;  %v1549_v10 = vsel %vm1548_vm7, 1, %v2714_v51 }
  0xe0   :  { %vm1566_vm9 = vc.u32 %v1558_v12, %v1562_v1  ;;  %v1568_v21 = vadd.s32 %v1562_v1, %v1558_v12  ;;  %v1551_v31 = vadd.s32 %v1549_v10, %v1547_v36  ;;  %v1648_v18 = vadd.s32 1, %v2623_v53 }
  0xe1   :  { %v1446_v58 = vand.u32 2147483647, %v1445_v44  ;;  %v1567_v2 = vsel %vm1566_vm9, 1, %v2714_v51  ;;  %v3493_v55 = vsel %vm3476_vm1, 0, %v1453_v23  ;;  %v1563_v4 = vshrl.u32 %v1559_v32, 16 }
  0xe2   :  { %v1569_v40 = vadd.s32 %v1567_v2, %v1561_v49  ;;  %vm1570_vm10 = vc.u32 %v1568_v21, %v1564_v14  ;;  %v1552_v25 = vadd.s32 %v1551_v31, %v1541_v45  ;;  %vm1649_vm0 = vcmp.gt.s32.totalorder %v1648_v18, 0 }
  0xe3   :  { %v1449_v43 = vmul.f32 %v1448_v9, %v1446_v58  ;;  %v1571_v26 = vsel %vm1570_vm10, 1, %v2714_v51  ;;  %v1522_v47 = vsel %vm1516_vm13, %v1519_v39, %v1521_v52  ;;  %v1565_v41 = vshrl.u32 %v1560_v57, 16 }
  0xe4   :  { %v1573_v7 = vadd.s32 %v1571_v26, %v1569_v40  ;;  %v1650_v61 = vsel %vm1649_vm0, %v1648_v18, 0  ;;  %v3498_v17 = vadd.s32 %v1552_v25, %v1543_v37  ;;  %v3500_v35 = vadd.s32 %v1568_v21, %v1564_v14 }
  0xe5   :  { %v1450_v63 = vxor.u32 2147483648, %v1449_v43  ;;  %v1652_v24 = vand.u32 31, %v1650_v61  ;;  %v1576_v3 = vmul.u32 %v3438_v48, %v1522_v47  ;;  %v1472_v60 = vadd.s32 3, %v3493_v55 }
  0xe6   :  { %v1574_v32 = vadd.s32 %v1573_v7, %v1563_v4  ;;  %v1645_v23 = vand.u32 8388607, %v1638_v22  ;;  %vm1578_vm3 = vc.u32 %v3498_v17, %v3500_v35  ;;  %v3515_v52 = vshrl.u32 %v1650_v61, 5 }
  0xe7   :  { %v1451_v54 = vsel %vm1330_vm14, %v1450_v63, %v1449_v43  ;;  %v3505_v59 = vsub.s32 32, %v1652_v24  ;;  %v1655_v48 = vshll.u32 %v2708_v28, %v1652_v24  ;;  %v1658_v13 = vshll.u32 %v2709_v30, %v1652_v24 }
  0xe8   :  { %v1454_v34 = vsel %vm3476_vm1, %v3080_v5, %v1451_v54  ;;  %v1575_v56 = vadd.s32 %v1574_v32, %v1565_v41  ;;  %v1664_v42 = vshll.u32 %v3790_v38, %v1652_v24  ;;  %v1661_v8 = vshll.u32 %v3789_v50, %v1652_v24 }
  0xe9   :  { %v1456_v39 = vmul.f32 %v1454_v34, %v1454_v34  ;;  %v1659_v0 = vshrl.u32 %v3789_v50, %v3505_v59  ;;  %v1662_v12 = vshrl.u32 %v3790_v38, %v3505_v59  ;;  %v1656_v53 = vshrl.u32 %v2709_v30, %v3505_v59 }
  0xea   :  { %v1579_v57 = vadd.s32 1, %v1575_v56  ;;  %v1665_v29 = vshrl.u32 %v3791_v16, %v3505_v59  ;;  %v1667_v62 = vshll.u32 %v3791_v16, %v1652_v24  ;;  %v1473_v33 = vand.u32 3, %v1472_v60 }
  0xeb   :  { %v1457_v46 = vmul.f32 -0.001358992, %v1456_v39  ;;  %v1464_v15 = vmul.f32 -0.00019511016, %v1456_v39  ;;  %v1646_v14 = vor.u32 8388608, %v1645_v23  ;;  %v3530_v44 = vor.u32 %v1659_v0, %v1658_v13 }
  0xec   :  { %v1580_v1 = vsel %vm1578_vm3, %v1579_v57, %v1575_v56  ;;  %v1666_v9 = vor.u32 %v1665_v29, %v1664_v42  ;;  %v1668_v36 = vshrl.u32 %v3792_v11, %v3505_v59  ;;  %v3534_v58 = vor.u32 %v1662_v12, %v1661_v8 }
  0xed   :  { %v1458_v6 = vadd.f32 0.041655596, %v1457_v46  ;;  %v1465_v45 = vadd.f32 0.008332121, %v1464_v15  ;;  %v1581_v49 = vadd.s32 %v1580_v1, %v1576_v3  ;;  %v3536_v31 = vor.u32 %v1656_v53, %v1655_v48 }
  0xee   :  { %v1669_v2 = vor.u32 %v1668_v36, %v1667_v62  ;;  %vm1670_vm4 = vcmp.lt.s32.totalorder %v3515_v52, 1  ;;  %vm1673_vm5 = vcmp.lt.s32.totalorder %v3515_v52, 4  ;;  %vm1672_vm6 = vcmp.lt.s32.totalorder %v3515_v52, 3 }
  0xef   :  { %v1459_v37 = vmul.f32 %v1458_v6, %v1456_v39  ;;  %v1466_v10 = vmul.f32 %v1465_v45, %v1456_v39  ;;  %v1582_v21 = vadd.s32 536870912, %v1581_v49  ;;  %vm1671_vm11 = vcmp.lt.s32.totalorder %v3515_v52, 2 }
  0xf0   :  { %v1679_v43 = vsel %vm1673_vm5, %v1666_v9, 920167782  ;;  %v1683_v25 = vsel %vm1673_vm5, %v1669_v2, 1326507024  ;;  %v3548_v26 = vshll.u32 %v1646_v14, 8  ;;  %v1682_v61 = vsel %vm1670_vm4, %v3530_v44, %v3534_v58 }
  0xf1   :  { %v1460_v18 = vadd.f32 -0.4999988, %v1459_v37  ;;  %v1467_v4 = vadd.f32 -0.16666654, %v1466_v10  ;;  %v3540_v40 = vshrl.u32 %v1582_v21, 30  ;;  %vm1471_vm12 = vweird.f32 %v3080_v5  ;;  %v2654_v10 = vld [vmem:[#allocation2 + $0x18] sm:$0xff] }
  0xf2   :  { %v1678_v63 = vsel %vm1670_vm4, %v3536_v31, %v3530_v44  ;;  %v1684_v24 = vsel %vm1672_vm6, %v1666_v9, %v1683_v25  ;;  %v1680_v60 = vsel %vm1672_vm6, %v3534_v58, %v1679_v43  ;;  %vm1478_vm13 = vcmp.eq.s32.totalorder %v1473_v33, 2 }
  0xf3   :  { %v1461_v47 = vmul.f32 %v1460_v18, %v1456_v39  ;;  %v1468_v41 = vmul.f32 %v1467_v4, %v1456_v39  ;;  %v1584_v7 = vshll.u32 %v3540_v40, 30  ;;  %v1685_v56 = vsel %vm1671_vm11, %v1682_v61, %v1684_v24 }
  0xf4   :  { %v1687_v23 = vand.u32 65535, %v3548_v26  ;;  %v1688_v39 = vshrl.u32 %v3548_v26, 16  ;;  %vm1475_vm14 = vcmp.eq.s32.totalorder %v1473_v33, 0  ;;  %v1681_v0 = vsel %vm1671_vm11, %v1678_v63, %v1680_v60 }
  0xf5   :  { %v3562_v32 = vadd.f32 1.0, %v1461_v47  ;;  %v1469_v54 = vadd.f32 1.0, %v1468_v41  ;;  %v1585_v3 = vsub.s32 %v1581_v49, %v1584_v7  ;;  %v1689_v42 = vand.u32 65535, %v1685_v56 }
  0xf6   :  { %v1690_v46 = vshrl.u32 %v1685_v56, 16  ;;  %vm1474_vm15 = vcmp.lt.s32.totalorder %v1473_v33, 2  ;;  %v1711_v6 = vand.u32 65535, %v1681_v0  ;;  %v1712_v45 = vshrl.u32 %v1681_v0, 16 }
  0xf7   :  { %v3571_v48 = vmul.f32 %v1469_v54, %v1454_v34  ;;  %v1479_v57 = vxor.u32 2147483648, %v3562_v32  ;;  %vm1586_vm8 = vcmp.lt.s32.totalorder %v1585_v3, 0  ;;  %v1587_v13 = vsub.s32 0, %v1585_v3 }
  0xf8   :  { %v1691_v1 = vmul.u32 %v1689_v42, %v1687_v23  ;;  %v1692_v53 = vmul.u32 %v1690_v46, %v1687_v23  ;;  %v3580_v29 = vmul.u32 %v1689_v42, %v1688_v39  ;;  %v1694_v14 = vmul.u32 %v1690_v46, %v1688_v39 }
  0xf9   :  { %v1476_v15 = vxor.u32 2147483648, %v3571_v48  ;;  %v1480_v8 = vsel %vm1478_vm13, %v1479_v57, %v3571_v48  ;;  %v1588_v12 = vsel %vm1586_vm8, %v1587_v13, %v1585_v3  ;;  %v3588_v21 = vmul.f32 8.0, %v2654_v10 }
  0xfa   :  { %v1589_v34 = vclz %v1588_v12  ;;  %v1695_v9 = vshll.u32 %v1692_v53, 16  ;;  %v1697_v37 = vshll.u32 %v3580_v29, 16  ;;  %v1577_v2 = vadd.s32 %v3500_v35, %v3498_v17 }
  0xfb   :  { %v1477_v62 = vsel %vm1475_vm14, %v3562_v32, %v1476_v15  ;;  %v1714_v25 = vmul.u32 %v1712_v45, %v1687_v23  ;;  %v1715_v47 = vmul.u32 %v1711_v6, %v1688_v39  ;;  %vm1485_vm7 = vcmp.lt.s32.totalorder %v3261_v27, 0 }
  0xfc   :  { %v1481_v49 = vsel %vm1474_vm15, %v1477_v62, %v1480_v8  ;;  %v2621_v33 = vadd.s32 4294967294, %v1589_v34  ;;  %vm1699_vm2 = vc.u32 %v1691_v1, %v1695_v9  ;;  %v1701_v18 = vadd.s32 %v1695_v9, %v1691_v1 }
  0xfd   :  { %v1482_v36 = vsel %vm1471_vm12, nan, %v1481_v49  ;;  %v1700_v43 = vsel %vm1699_vm2, 1, %v2714_v51  ;;  %v1654_v24 = vshrl.u32 %v2708_v28, %v3505_v59  ;;  %v1696_v54 = vshrl.u32 %v1692_v53, 16 }
  0xfe   :  { %2565 = vst [vmem:[#allocation5 + $0xc0] sm:$0xff] %v1482_v36  ;;  %vm2622_vm1 = vcmp.lt.s32.totalorder %v2621_v33, 0  ;;  %v1702_v63 = vadd.s32 %v1700_v43, %v1694_v14  ;;  %vm1703_vm9 = vc.u32 %v1701_v18, %v1697_v37  ;;  %v1713_v17 = vmul.u32 %v1711_v6, %v1687_v23 }
  0xff   :  { %v1592_v4 = vsel %vm2622_vm1, 0, %v2621_v33  ;;  %v1675_v56 = vsel %vm1673_vm5, %v3534_v58, 2102212464  ;;  %v1704_v13 = vsel %vm1703_vm9, 1, %v2714_v51  ;;  %v1716_v42 = vmul.u32 %v1712_v45, %v1688_v39 }
 0x100   :  { %v1593_v41 = vsub.s32 32, %v1592_v4  ;;  %v1594_v7 = vshll.u32 %v1585_v3, %v1592_v4  ;;  %v1597_v61 = vsub.s32 4294967266, %v1592_v4  ;;  %v1706_v0 = vadd.s32 %v1704_v13, %v1702_v63 }
 0x101   :  { %v1717_v46 = vshll.u32 %v1714_v25, 16  ;;  %v1719_v3 = vshll.u32 %v1715_v47, 16  ;;  %v1607_v34 = vsub.s32 4, %v3540_v40  ;;  %v1796_v59 = vand.u32 2139095040, %v3588_v21 }
 0x102   :  { %v1595_v35 = vshrl.u32 %v1577_v2, %v1593_v41  ;;  %v1598_v60 = vadd.s32 127, %v1597_v61  ;;  %v1698_v23 = vshrl.u32 %v3580_v29, 16  ;;  %v1707_v1 = vadd.s32 %v1706_v0, %v1696_v54 }
 0x103   :  { %vm1721_vm10 = vc.u32 %v1713_v17, %v1717_v46  ;;  %v1723_v53 = vadd.s32 %v1717_v46, %v1713_v17  ;;  %v1797_v49 = vshrl.u32 %v1796_v59, 23  ;;  %v1674_v39 = vsel %vm1670_vm4, %v1654_v24, %v3536_v31 }
 0x104   :  { %v1596_v8 = vor.u32 %v1595_v35, %v1594_v7  ;;  %v1599_v12 = vshll.u32 %v1598_v60, 23  ;;  %v1722_v58 = vsel %vm1721_vm10, 1, %v2714_v51  ;;  %v1718_v45 = vshrl.u32 %v1714_v25, 16 }
 0x105   :  { %v1724_v33 = vadd.s32 %v1722_v58, %v1716_v42  ;;  %vm1725_vm0 = vc.u32 %v1723_v53, %v1719_v3  ;;  %v1676_v29 = vsel %vm1672_vm6, %v3530_v44, %v1675_v56  ;;  %v2626_v36 = vadd.s32 4294967169, %v1797_v49 }
 0x106   :  { %v1600_v62 = vor.u32 4788187, %v1599_v12  ;;  %v1603_v6 = vcvt.s32.f32 %v1596_v8  ;;  %v1726_v9 = vsel %vm1725_vm0, 1, %v2714_v51  ;;  %v1608_v37 = vsel %vm1485_vm7, %v1607_v34, %v3540_v40 }
 0x107   :  { %v1720_v10 = vshrl.u32 %v1715_v47, 16  ;;  %v1728_v2 = vadd.s32 %v1726_v9, %v1724_v33  ;;  %v3614_v4 = vadd.s32 %v1707_v1, %v1698_v23  ;;  %v3616_v31 = vadd.s32 %v1723_v53, %v1719_v3 }
 0x108   :  { %v1601_v14 = vand.u32 2147483647, %v1600_v62  ;;  %v1803_v43 = vadd.s32 1, %v2626_v36  ;;  %v1677_v25 = vsel %vm1671_vm11, %v1674_v39, %v1676_v29  ;;  %vm1484_vm3 = vcmp.le.f32.partialorder %v1483_v20, 0.7853982 }
 0x109   :  { %v1729_v41 = vadd.s32 %v1728_v2, %v1718_v45  ;;  %v3622_v7 = vsel %vm1484_vm3, 0, %v1608_v37  ;;  %v1793_v47 = vand.u32 2147483647, %v3588_v21  ;;  %v1731_v24 = vmul.u32 %v3548_v26, %v1677_v25 }
 0x10a   :  { %v1604_v18 = vmul.f32 %v1603_v6, %v1601_v14  ;;  %vm1804_vm4 = vcmp.gt.s32.totalorder %v1803_v43, 0  ;;  %vm1733_vm5 = vc.u32 %v3614_v4, %v3616_v31  ;;  %v1627_v60 = vadd.s32 3, %v3622_v7 }
 0x10b   :  { %v1730_v40 = vadd.s32 %v1729_v41, %v1720_v10  ;;  %v1805_v61 = vsel %vm1804_vm4, %v1803_v43, 0  ;;  %v1800_v13 = vand.u32 8388607, %v1793_v47  ;;  %vm1626_vm6 = vweird.f32 %v3261_v27 }
 0x10c   :  { %v1605_v44 = vxor.u32 2147483648, %v1604_v18  ;;  %v1807_v52 = vand.u32 31, %v1805_v61  ;;  %v3636_v0 = vshrl.u32 %v1805_v61, 5  ;;  %v1628_v14 = vand.u32 3, %v1627_v60 }
 0x10d   :  { %v1734_v20 = vadd.s32 1, %v1730_v40  ;;  %v1801_v29 = vor.u32 8388608, %v1800_v13 }
 0x10e   :  { %v1606_v63 = vsel %vm1485_vm7, %v1605_v44, %v1604_v18  ;;  %v3631_v35 = vsub.s32 32, %v1807_v52  ;;  %v1810_v3 = vshll.u32 %v2708_v28, %v1807_v52  ;;  %v1813_v12 = vshll.u32 %v2709_v30, %v1807_v52 }
 0x10f   :  { %v1609_v54 = vsel %vm1484_vm3, %v3261_v27, %v1606_v63  ;;  %v1735_v56 = vsel %vm1733_vm5, %v1734_v20, %v1730_v40  ;;  %v1816_v34 = vshll.u32 %v3789_v50, %v1807_v52  ;;  %v1819_v59 = vshll.u32 %v3790_v38, %v1807_v52 }
 0x110   :  { %v1611_v17 = vmul.f32 %v1609_v54, %v1609_v54  ;;  %v1736_v46 = vadd.s32 %v1735_v56, %v1731_v24  ;;  %v1811_v8 = vshrl.u32 %v2709_v30, %v3631_v35  ;;  %v1814_v62 = vshrl.u32 %v3789_v50, %v3631_v35 }
 0x111   :  { %v1817_v6 = vshrl.u32 %v3790_v38, %v3631_v35  ;;  %v1820_v58 = vshrl.u32 %v3791_v16, %v3631_v35  ;;  %v1822_v49 = vshll.u32 %v3791_v16, %v1807_v52  ;;  %v1823_v30 = vshrl.u32 %v3792_v11, %v3631_v35 }
 0x112   :  { %v1612_v42 = vmul.f32 -0.001358992, %v1611_v17  ;;  %v1619_v26 = vmul.f32 -0.00019511016, %v1611_v17  ;;  %v1737_v53 = vadd.s32 536870912, %v1736_v46  ;;  %v3655_v9 = vor.u32 %v1811_v8, %v1810_v3 }
 0x113   :  { %v1821_v50 = vor.u32 %v1820_v58, %v1819_v59  ;;  %v3658_v10 = vor.u32 %v1814_v62, %v1813_v12  ;;  %v3661_v16 = vor.u32 %v1817_v6, %v1816_v34  ;;  %v1824_v11 = vor.u32 %v1823_v30, %v1822_v49 }
 0x114   :  { %v1613_v23 = vadd.f32 0.041655596, %v1612_v42  ;;  %v1620_v1 = vadd.f32 0.008332121, %v1619_v26  ;;  %v3653_v33 = vshrl.u32 %v1737_v53, 30  ;;  %vm1825_vm11 = vcmp.lt.s32.totalorder %v3636_v0, 1 }
 0x115   :  { %vm1828_vm13 = vcmp.lt.s32.totalorder %v3636_v0, 4  ;;  %vm1827_vm8 = vcmp.lt.s32.totalorder %v3636_v0, 3  ;;  %vm1633_vm14 = vcmp.eq.s32.totalorder %v1628_v14, 2  ;;  %vm1826_vm15 = vcmp.lt.s32.totalorder %v3636_v0, 2 }
 0x116   :  { %v1614_v39 = vmul.f32 %v1613_v23, %v1611_v17  ;;  %v1621_v45 = vmul.f32 %v1620_v1, %v1611_v17  ;;  %v1739_v38 = vshll.u32 %v3653_v33, 30  ;;  %v1834_v25 = vsel %vm1828_vm13, %v1821_v50, 920167782 }
 0x117   :  { %v3669_v41 = vshll.u32 %v1801_v29, 8  ;;  %v1833_v63 = vsel %vm1825_vm11, %v3655_v9, %v3658_v10  ;;  %v1835_v24 = vsel %vm1827_vm8, %v3661_v16, %v1834_v25  ;;  %v1837_v52 = vsel %vm1825_vm11, %v3658_v10, %v3661_v16 }
 0x118   :  { %v1615_v36 = vadd.f32 -0.4999988, %v1614_v39  ;;  %v1622_v37 = vadd.f32 -0.16666654, %v1621_v45  ;;  %v1740_v43 = vsub.s32 %v1736_v46, %v1739_v38  ;;  %v1838_v20 = vsel %vm1828_vm13, %v1824_v11, 1326507024 }
 0x119   :  { %vm1629_vm2 = vcmp.lt.s32.totalorder %v1628_v14, 2  ;;  %vm1630_vm7 = vcmp.eq.s32.totalorder %v1628_v14, 0  ;;  %v1839_v42 = vsel %vm1827_vm8, %v1821_v50, %v1838_v20  ;;  %v1842_v26 = vand.u32 65535, %v3669_v41 }
 0x11a   :  { %v1616_v2 = vmul.f32 %v1615_v36, %v1611_v17  ;;  %v1623_v18 = vmul.f32 %v1622_v37, %v1611_v17  ;;  %vm1741_vm1 = vcmp.lt.s32.totalorder %v1740_v43, 0  ;;  %v1742_v61 = vsub.s32 0, %v1740_v43 }
 0x11b   :  { %v1840_v8 = vsel %vm1826_vm15, %v1837_v52, %v1839_v42  ;;  %v1843_v34 = vshrl.u32 %v3669_v41, 16  ;;  %v1732_v6 = vadd.s32 %v3616_v31, %v3614_v4  ;;  %v1809_v14 = vshrl.u32 %v2708_v28, %v3631_v35 }
 0x11c   :  { %v3671_v44 = vadd.f32 1.0, %v1616_v2  ;;  %v1624_v40 = vadd.f32 1.0, %v1623_v18  ;;  %v1743_v56 = vsel %vm1741_vm1, %v1742_v61, %v1740_v43  ;;  %v1844_v59 = vand.u32 65535, %v1840_v8 }
 0x11d   :  { %v1744_v13 = vclz %v1743_v56  ;;  %v1845_v23 = vshrl.u32 %v1840_v8, 16  ;;  %vm1640_vm5 = vcmp.lt.s32.totalorder %v3429_v19, 0 }
 0x11e   :  { %v3686_v17 = vmul.f32 %v1624_v40, %v1609_v54  ;;  %v1634_v60 = vxor.u32 2147483648, %v3671_v44  ;;  %v1836_v54 = vsel %vm1826_vm15, %v1833_v63, %v1835_v24  ;;  %v1846_v39 = vmul.u32 %v1844_v59, %v1842_v26 }
 0x11f   :  { %v2624_v12 = vadd.s32 4294967294, %v1744_v13  ;;  %v1866_v53 = vand.u32 65535, %v1836_v54  ;;  %v1867_v58 = vshrl.u32 %v1836_v54, 16  ;;  %v1847_v45 = vmul.u32 %v1845_v23, %v1842_v26 }
 0x120   :  { %v1631_v46 = vxor.u32 2147483648, %v3686_v17  ;;  %v1635_v3 = vsel %vm1633_vm14, %v1634_v60, %v3686_v17  ;;  %v1848_v37 = vmul.u32 %v1844_v59, %v1843_v34  ;;  %v1849_v4 = vmul.u32 %v1845_v23, %v1843_v34 }
 0x121   :  { %vm2625_vm9 = vcmp.lt.s32.totalorder %v2624_v12, 0  ;;  %v1870_v38 = vmul.u32 %v1866_v53, %v1843_v34  ;;  %v1850_v31 = vshll.u32 %v1847_v45, 16  ;;  %v1851_v18 = vshrl.u32 %v1847_v45, 16 }
 0x122   :  { %v1632_v1 = vsel %vm1630_vm7, %v3671_v44, %v1631_v46  ;;  %v1747_v30 = vsel %vm2625_vm9, 0, %v2624_v12  ;;  %v1852_v25 = vshll.u32 %v1848_v37, 16  ;;  %v1868_v40 = vmul.u32 %v1866_v53, %v1842_v26 }
 0x123   :  { %v1636_v62 = vsel %vm1629_vm2, %v1632_v1, %v1635_v3  ;;  %v1748_v29 = vsub.s32 32, %v1747_v30  ;;  %v1749_v50 = vshll.u32 %v1740_v43, %v1747_v30  ;;  %v1752_v36 = vsub.s32 4294967266, %v1747_v30 }
 0x124   :  { %v1637_v49 = vsel %vm1626_vm6, nan, %v1636_v62  ;;  %v1869_v61 = vmul.u32 %v1867_v58, %v1842_v26  ;;  %vm1854_vm10 = vc.u32 %v1846_v39, %v1850_v31  ;;  %v1856_v52 = vadd.s32 %v1850_v31, %v1846_v39 }
 0x125   :  { %2566 = vst [vmem:[#allocation5 + $0xc8] sm:$0xff] %v1637_v49  ;;  %v1750_v11 = vshrl.u32 %v1732_v6, %v1748_v29  ;;  %v1753_v2 = vadd.s32 127, %v1752_v36  ;;  %v1855_v43 = vsel %vm1854_vm10, 1, %v2714_v51  ;;  %v1871_v20 = vmul.u32 %v1867_v58, %v1843_v34 }
 0x126   :  { %v1872_v56 = vshll.u32 %v1869_v61, 16  ;;  %v1874_v13 = vshll.u32 %v1870_v38, 16  ;;  %v1857_v35 = vadd.s32 %v1855_v43, %v1849_v4  ;;  %vm1858_vm0 = vc.u32 %v1856_v52, %v1852_v25 }
 0x127   :  { %v1751_v63 = vor.u32 %v1750_v11, %v1749_v50  ;;  %v1754_v24 = vshll.u32 %v1753_v2, 23  ;;  %v1830_v3 = vsel %vm1828_vm13, %v3661_v16, 2102212464  ;;  %v1859_v54 = vsel %vm1858_vm0, 1, %v2714_v51 }
 0x128   :  { %vm1876_vm3 = vc.u32 %v1868_v40, %v1872_v56  ;;  %v1878_v26 = vadd.s32 %v1872_v56, %v1868_v40  ;;  %v1853_v12 = vshrl.u32 %v1848_v37, 16  ;;  %v1861_v59 = vadd.s32 %v1859_v54, %v1857_v35 }
 0x129   :  { %v1755_v42 = vor.u32 4788187, %v1754_v24  ;;  %v1758_v28 = vcvt.s32.f32 %v1751_v63  ;;  %v1877_v23 = vsel %vm1876_vm3, 1, %v2714_v51  ;;  %v1829_v34 = vsel %vm1825_vm11, %v1809_v14, %v3655_v9 }
 0x12a   :  { %v1873_v1 = vshrl.u32 %v1869_v61, 16  ;;  %v1879_v53 = vadd.s32 %v1877_v23, %v1871_v20  ;;  %vm1880_vm4 = vc.u32 %v1878_v26, %v1874_v13  ;;  %v1831_v16 = vsel %vm1827_vm8, %v3658_v10, %v1830_v3 }
 0x12b   :  { %v1756_v8 = vand.u32 2147483647, %v1755_v42  ;;  %v1862_v6 = vadd.s32 %v1861_v59, %v1851_v18  ;;  %v1881_v58 = vsel %vm1880_vm4, 1, %v2714_v51  ;;  %v1762_v49 = vsub.s32 4, %v3653_v33 }
 0x12c   :  { %v1875_v30 = vshrl.u32 %v1870_v38, 16  ;;  %v1883_v39 = vadd.s32 %v1881_v58, %v1879_v53  ;;  %vm1639_vm11 = vcmp.le.f32.partialorder %v1638_v22, 0.7853982  ;;  %v1882_v29 = vadd.s32 %v1878_v26, %v1874_v13 }
 0x12d   :  { %v1759_v62 = vmul.f32 %v1758_v28, %v1756_v8  ;;  %v1863_v45 = vadd.s32 %v1862_v6, %v1853_v12  ;;  %v1832_v50 = vsel %vm1826_vm15, %v1829_v34, %v1831_v16  ;;  %v1763_v37 = vsel %vm1640_vm5, %v1762_v49, %v3653_v33 }
 0x12e   :  { %v1884_v36 = vadd.s32 %v1883_v39, %v1873_v1  ;;  %v1886_v38 = vmul.u32 %v3669_v41, %v1832_v50  ;;  %v1765_v4 = vsel %vm1639_vm11, 0, %v1763_v37  ;;  %vm1781_vm2 = vweird.f32 %v3429_v19 }
 0x12f   :  { %v1760_v9 = vxor.u32 2147483648, %v1759_v62  ;;  %vm1888_vm13 = vc.u32 %v1863_v45, %v1882_v29  ;;  %v1782_v61 = vadd.s32 3, %v1765_v4  ;;  %v1887_v6 = vadd.s32 %v1882_v29, %v1863_v45 }
 0x130   :  { %v1885_v14 = vadd.s32 %v1884_v36, %v1875_v30  ;;  %v2092_v49 = vand.u32 3, %v3493_v55  ;;  %v2246_v30 = vand.u32 3, %v3622_v7  ;;  %v2400_v36 = vand.u32 3, %v1765_v4 }
 0x131   :  { %v1761_v10 = vsel %vm1640_vm5, %v1760_v9, %v1759_v62  ;;  %v1783_v56 = vand.u32 3, %v1782_v61 }
 0x132   :  { %v1764_v51 = vsel %vm1639_vm11, %v3429_v19, %v1761_v10  ;;  %v1889_v2 = vadd.s32 1, %v1885_v14  ;;  %vm2094_vm9 = vcmp.eq.s32.totalorder %v2092_v49, 0  ;;  %vm2093_vm10 = vcmp.lt.s32.totalorder %v2092_v49, 2 }
 0x133   :  { %v1766_v11 = vmul.f32 %v1764_v51, %v1764_v51  ;;  %vm1788_vm8 = vcmp.eq.s32.totalorder %v1783_v56, 2  ;;  %vm1785_vm15 = vcmp.eq.s32.totalorder %v1783_v56, 0  ;;  %vm1784_vm1 = vcmp.lt.s32.totalorder %v1783_v56, 2 }
 0x134   :  { %v1890_v18 = vsel %vm1888_vm13, %v1889_v2, %v1885_v14  ;;  %vm2097_vm0 = vcmp.eq.s32.totalorder %v2092_v49, 2  ;;  %vm2247_vm3 = vcmp.lt.s32.totalorder %v2246_v30, 2  ;;  %vm2248_vm4 = vcmp.eq.s32.totalorder %v2246_v30, 0 }
 0x135   :  { %v1767_v22 = vmul.f32 -0.001358992, %v1766_v11  ;;  %v1774_v31 = vmul.f32 -0.00019511016, %v1766_v11  ;;  %v1891_v0 = vadd.s32 %v1890_v18, %v1886_v38  ;;  %vm2251_vm5 = vcmp.eq.s32.totalorder %v2246_v30, 2 }
 0x136   :  { %v2099_v7 = vsel %vm2097_vm0, %v1479_v57, %v3571_v48  ;;  %v2250_v29 = vsel %vm2248_vm4, %v3671_v44, %v1631_v46  ;;  %vm2401_vm11 = vcmp.lt.s32.totalorder %v2400_v36, 2  ;;  %vm2402_vm13 = vcmp.eq.s32.totalorder %v2400_v36, 0 }
 0x137   :  { %v1768_v25 = vadd.f32 0.041655596, %v1767_v22  ;;  %v1775_v40 = vadd.f32 0.008332121, %v1774_v31  ;;  %v1892_v52 = vadd.s32 536870912, %v1891_v0 }
 0x139   :  { %v1769_v63 = vmul.f32 %v1768_v25, %v1766_v11  ;;  %v1776_v24 = vmul.f32 %v1775_v40, %v1766_v11  ;;  %v3734_v20 = vshrl.u32 %v1892_v52, 30 }
 0x13b   :  { %v1770_v33 = vadd.f32 -0.4999988, %v1769_v63  ;;  %v1777_v43 = vadd.f32 -0.16666654, %v1776_v24  ;;  %v1894_v42 = vshll.u32 %v3734_v20, 30  ;;  %v1917_v5 = vsub.s32 4, %v3734_v20 }
 0x13d   :  { %v1771_v13 = vmul.f32 %v1770_v33, %v1766_v11  ;;  %v1778_v41 = vmul.f32 %v1777_v43, %v1766_v11  ;;  %v1895_v3 = vsub.s32 %v1891_v0, %v1894_v42  ;;  %v2253_v11 = vsel %vm2251_vm5, %v1634_v60, %v3686_v17 }
 0x13e   :  { %v2254_v4 = vsel %vm2247_vm3, %v2250_v29, %v2253_v11 }
 0x13f   :  { %v1772_v28 = vadd.f32 1.0, %v1771_v13  ;;  %v1779_v35 = vadd.f32 1.0, %v1778_v41  ;;  %vm1896_vm14 = vcmp.lt.s32.totalorder %v1895_v3, 0  ;;  %v1897_v8 = vsub.s32 0, %v1895_v3 }
 0x141   :  { %v1780_v54 = vmul.f32 %v1779_v35, %v1764_v51  ;;  %v1789_v26 = vxor.u32 2147483648, %v1772_v28  ;;  %v1898_v23 = vsel %vm1896_vm14, %v1897_v8, %v1895_v3  ;;  %v2096_v51 = vsel %vm2094_vm9, %v3562_v32, %v1476_v15 }
 0x142   :  { %v1899_v34 = vclz %v1898_v23  ;;  %v2100_v14 = vsel %vm2093_vm10, %v2096_v51, %v2099_v7  ;;  %v2255_v32 = vsel %vm1626_vm6, nan, %v2254_v4  ;;  %vm1795_vm14 = vcmp.lt.s32.totalorder %v3588_v21, 0 }
 0x143   :  { %v1786_v12 = vxor.u32 2147483648, %v1780_v54  ;;  %v1790_v59 = vsel %vm1788_vm8, %v1789_v26, %v1780_v54  ;;  %v2101_v2 = vsel %vm1471_vm12, nan, %v2100_v14  ;;  %vm2405_vm8 = vcmp.eq.s32.totalorder %v2400_v36, 2  ;;  %2571 = vst [vmem:[#allocation5 + $0xe8] sm:$0xff] %v2255_v32 }
 0x144   :  { %v2627_v62 = vadd.s32 4294967294, %v1899_v34  ;;  %2570 = vst [vmem:[#allocation5 + $0xe0] sm:$0xff] %v2101_v2  ;;  %v2407_v46 = vsel %vm2405_vm8, %v1789_v26, %v1780_v54  ;;  %vm1794_vm12 = vcmp.le.f32.partialorder %v1793_v47, 0.7853982  ;;  %v1918_v31 = vsel %vm1795_vm14, %v1917_v5, %v3734_v20 }
 0x145   :  { %v1787_v1 = vsel %vm1785_vm15, %v1772_v28, %v1786_v12  ;;  %v2404_v48 = vsel %vm2402_vm13, %v1772_v28, %v1786_v12  ;;  %v1920_v40 = vsel %vm1794_vm12, 0, %v1918_v31  ;;  %vm1936_vm10 = vweird.f32 %v3588_v21 }
 0x146   :  { %v1791_v53 = vsel %vm1784_vm1, %v1787_v1, %v1790_v59  ;;  %vm2628_vm7 = vcmp.lt.s32.totalorder %v2627_v62, 0  ;;  %v2408_v22 = vsel %vm2401_vm11, %v2404_v48, %v2407_v46  ;;  %v1937_v24 = vadd.s32 3, %v1920_v40 }
 0x147   :  { %v1792_v16 = vsel %vm1781_vm2, nan, %v1791_v53  ;;  %v1902_v58 = vsel %vm2628_vm7, 0, %v2627_v62  ;;  %v2409_v17 = vsel %vm1781_vm2, nan, %v2408_v22  ;;  %v2554_v41 = vand.u32 3, %v1920_v40 }
 0x148   :  { %2567 = vst [vmem:[#allocation5 + $0xd0] sm:$0xff] %v1792_v16  ;;  %v1903_v39 = vsub.s32 32, %v1902_v58  ;;  %v1904_v9 = vshll.u32 %v1895_v3, %v1902_v58  ;;  %v1907_v50 = vsub.s32 4294967266, %v1902_v58  ;;  %v1938_v13 = vand.u32 3, %v1937_v24 }
 0x149   :  { %2572 = vst [vmem:[#allocation5 + $0xf0] sm:$0xff] %v2409_v17  ;;  %vm2559_vm15 = vcmp.eq.s32.totalorder %v2554_v41, 2  ;;  %vm2556_vm7 = vcmp.eq.s32.totalorder %v2554_v41, 0  ;;  %vm2555_vm9 = vcmp.lt.s32.totalorder %v2554_v41, 2 }
 0x14a   :  { %v1905_v10 = vshrl.u32 %v1887_v6, %v1903_v39  ;;  %v1908_v37 = vadd.s32 127, %v1907_v50  ;;  %vm1943_vm6 = vcmp.eq.s32.totalorder %v1938_v13, 2  ;;  %vm1939_vm1 = vcmp.lt.s32.totalorder %v1938_v13, 2 }
 0x14b   :  { %vm1940_vm2 = vcmp.eq.s32.totalorder %v1938_v13, 0 }
 0x14c   :  { %v1906_v45 = vor.u32 %v1905_v10, %v1904_v9  ;;  %v1909_v55 = vshll.u32 %v1908_v37, 23 }
 0x14e   :  { %v1910_v15 = vor.u32 4788187, %v1909_v55  ;;  %v1913_v38 = vcvt.s32.f32 %v1906_v45 }
 0x150   :  { %v1911_v57 = vand.u32 2147483647, %v1910_v15 }
 0x152   :  { %v1914_v44 = vmul.f32 %v1913_v38, %v1911_v57 }
 0x154   :  { %v1915_v27 = vxor.u32 2147483648, %v1914_v44 }
 0x156   :  { %v1916_v60 = vsel %vm1795_vm14, %v1915_v27, %v1914_v44 }
 0x157   :  { %v1919_v18 = vsel %vm1794_vm12, %v3588_v21, %v1916_v60 }
 0x158   :  { %v1921_v25 = vmul.f32 %v1919_v18, %v1919_v18 }
 0x15a   :  { %v1922_v0 = vmul.f32 -0.001358992, %v1921_v25  ;;  %v1929_v61 = vmul.f32 -0.00019511016, %v1921_v25 }
 0x15c   :  { %v1923_v19 = vadd.f32 0.041655596, %v1922_v0  ;;  %v1930_v63 = vadd.f32 0.008332121, %v1929_v61 }
 0x15e   :  { %v1924_v52 = vmul.f32 %v1923_v19, %v1921_v25  ;;  %v1931_v33 = vmul.f32 %v1930_v63, %v1921_v25 }
 0x160   :  { %v1925_v43 = vadd.f32 -0.4999988, %v1924_v52  ;;  %v1932_v56 = vadd.f32 -0.16666654, %v1931_v33 }
 0x162   :  { %v1926_v47 = vmul.f32 %v1925_v43, %v1921_v25  ;;  %v1933_v42 = vmul.f32 %v1932_v56, %v1921_v25 }
 0x164   :  { %v1927_v28 = vadd.f32 1.0, %v1926_v47  ;;  %v1934_v35 = vadd.f32 1.0, %v1933_v42 }
 0x166   :  { %v1935_v20 = vmul.f32 %v1934_v35, %v1919_v18  ;;  %v1944_v3 = vxor.u32 2147483648, %v1927_v28 }
 0x168   :  { %v1941_v54 = vxor.u32 2147483648, %v1935_v20  ;;  %v1945_v26 = vsel %vm1943_vm6, %v1944_v3, %v1935_v20  ;;  %v2561_v8 = vsel %vm2559_vm15, %v1944_v3, %v1935_v20 }
 0x16a   :  { %v1942_v12 = vsel %vm1940_vm2, %v1927_v28, %v1941_v54  ;;  %v2558_v59 = vsel %vm2556_vm7, %v1927_v28, %v1941_v54 }
 0x16b   :  { %v1946_v23 = vsel %vm1939_vm1, %v1942_v12, %v1945_v26  ;;  %v2562_v34 = vsel %vm2555_vm9, %v2558_v59, %v2561_v8 }
 0x16c   :  { %v1947_v1 = vsel %vm1936_vm10, nan, %v1946_v23  ;;  %v2563_v53 = vsel %vm1936_vm10, nan, %v2562_v34 }
 0x16d   :  { %2568 = vst [vmem:[#allocation5 + $0xd8] sm:$0xff] %v1947_v1 }
 0x16e   :  { %2573 = vst [vmem:[#allocation5 + $0xf8] sm:$0xff] %v2563_v53 }
 0x16f   :  { %2586 = dma.vmem_to_hbm [thread:$0]  %s2579_s11, 4096, %s2581_s14, [#allocation4], %s2716_s15, %s2716_s15, %s2717_s16  }
 0x170   :  { %2705 = dma.done.wait [#allocation4], 4096  }
 0x171   :  { %2706 = vsyncadd [#allocation4], 4294963200 }
 0x172   :  { %2591 = vsyncpa [#allocation3], 1 }
 0x173   :  { %2592 = vsyncpa [#allocation4], 1 }

</bundles_post_ra>
